<compile_context>
chip_gen: v7x
topology: tpu7x:2x2x1
jax: 0.10.0
libtpu: 0.0.40
codegen_flags: <defaults>
</compile_context>

<pallas_src>
import functools
import numpy as np
import jax
import jax.numpy as jnp
from jax import lax
from jax.experimental import pallas as pl
from jax.experimental.pallas import tpu as pltpu

BN_EPS = 1e-5
LANE = 128


def _round_up(n, m):
    return ((n + m - 1) // m) * m


def _bn_eval(x, g, b, m, v):
    return (x - m) * lax.rsqrt(v + BN_EPS) * g + b


# ----------------------------------------------------------------------------
# Static index maps into the consolidated weight / bias slabs
# ----------------------------------------------------------------------------
def _w_index(num_extra):
    idx = {"Wz2": 0, "We1": 1, "W1a": 2, "W1b": 3, "Wl1": 4, "Wl2": 5}
    for l in range(num_extra):
        idx[f"WeL{l}"] = 6 + 3 * l
        idx[f"WLa{l}"] = 6 + 3 * l + 1
        idx[f"WLb{l}"] = 6 + 3 * l + 2
    return idx, 6 + 3 * num_extra


def _b_index(num_extra):
    idx = {"bz1": 0, "bz2": 1, "bedge1": 2, "b1a": 3, "b1b": 4, "bl1": 5, "bl2": 6}
    for l in range(num_extra):
        idx[f"beL{l}"] = 7 + 3 * l
        idx[f"bLa{l}"] = 7 + 3 * l + 1
        idx[f"bLb{l}"] = 7 + 3 * l + 2
    return idx, 7 + 3 * num_extra


# ----------------------------------------------------------------------------
# Pallas kernel
# ----------------------------------------------------------------------------
def _make_kernel(num_extra):
    widx, _ = _w_index(num_extra)
    bidx, _ = _b_index(num_extra)

    def kernel(x_ref, edge_pos_ref, src_ref, tgt_ref, pool_ref,
               Wz_ref, W_ref, b_ref, out_ref):
        f32 = jnp.float32
        bf16 = jnp.bfloat16
        dot = functools.partial(jnp.dot, preferred_element_type=f32)

        def W(name):
            return W_ref[widx[name]]          # [Hp, Hp] bf16, static index

        def b(name):
            i = bidx[name]
            return b_ref[i:i + 1, :]          # [1, Hp] f32, static slice

        # --- z_emb = z_embedding( edge_pos @ z_initial.weight ) -------------
        # Eval-mode BatchNorms are folded into the adjacent Linears host-side.
        # bf16 operands / f32 accumulate on the MXU; elementwise stays f32.
        # TODO(synk): at realistic E, replace this dense [E,Zp]@[Zp,Hp] with a
        # scalar-prefetch embedding-bag gather (edge_pos is ~5% dense).
        z = dot(edge_pos_ref[...], Wz_ref[...]) + b("bz1")          # [E, Hp] f32
        z = jnp.maximum(z, 0.0)
        z = dot(z.astype(bf16), W("Wz2")) + b("bz2")
        z = jnp.maximum(z, 0.0)
        z_bf = z.astype(bf16)                                       # reused by every conv

        src = src_ref[...]                      # [E, N]  bf16 one-hot
        tgt = tgt_ref[...]                      # [N, E]  bf16 one-hot^T
        x = x_ref[...].astype(f32)              # [N, Fp] (0/1 one-hot, zero-padded lanes)

        # GINEConv, train_eps=False (eps = 0):
        #   out_i = MLP( x_i + sum_{j->i} ReLU( x_j + Lin_edge(z_emb_e) ) )
        # TODO(synk): at realistic N/E, replace the dense one-hot matmuls with
        # scalar-prefetched index gather / scatter-add into a VMEM accumulator.
        def gine(x, We, be, Wa, ba, Wb, bb):
            e = dot(z_bf, We) + be                              # edge lin: [E, d]
            x_src = dot(src, x.astype(bf16))                    # gather x_j : [E, d]
            msg = jnp.maximum(x_src + e, 0.0)                   # ReLU(x_j + edge_attr)
            aggr = dot(tgt, msg.astype(bf16))                   # scatter-add : [N, d]
            h = aggr + x                                        # (1 + eps) * x_i, eps = 0
            h = jnp.maximum(dot(h.astype(bf16), Wa) + ba, 0.0)  # nn: Linear -> ReLU
            h = jnp.maximum(dot(h.astype(bf16), Wb) + bb, 0.0)  #     Linear -> ReLU
            return h

        # conv1 (node features Fp -> hidden Hp)
        x = gine(x, W("We1"), b("bedge1"), W("W1a"), b("b1a"), W("W1b"), b("b1b"))
        # remaining convs (hidden -> hidden), static unroll
        for l in range(num_extra):
            x = gine(x, W(f"WeL{l}"), b(f"beL{l}"),
                     W(f"WLa{l}"), b(f"bLa{l}"), W(f"WLb{l}"), b(f"bLb{l}"))

        # --- readout ---------------------------------------------------------
        p = dot(pool_ref[...], x.astype(bf16))                          # global_add_pool [B, Hp]
        p = jnp.maximum(dot(p.astype(bf16), W("Wl1")) + b("bl1"), 0.0)  # relu(lin1)
        # TODO(synk): F.dropout(p=0.5) implemented as identity (eval mode).
        p = dot(p.astype(bf16), W("Wl2")) + b("bl2")                    # lin2
        # bl2 carries a -1e30 bias on padded class lanes, so plain log_softmax
        # over the lane-dense [B, Hp] block ignores padding; wrapper slices.
        m = jnp.max(p, axis=1, keepdims=True)
        s = p - m
        lse = jnp.log(jnp.sum(jnp.exp(s), axis=1, keepdims=True))
        out_ref[...] = s - lse

    return kernel


def nested_gin_forward(inputs, kparams, num_extra, num_classes):
    x, edge_pos, src_oh, tgt_oh, pool_oh = inputs
    Wz, W_stack, b_stack = kparams
    B = pool_oh.shape[0]
    Hp = W_stack.shape[-1]
    vmem = pl.BlockSpec(memory_space=pltpu.MemorySpace.VMEM)
    # Single-shot (no grid): at toy sizes (E=24, N=16) the whole problem is
    # ~1.5 MiB and launch/DMA-descriptor bound; 8 consolidated inputs keep DMA
    # count minimal and per-step grid overhead would dominate.
    # TODO(synk): at real graph sizes, grid over E-chunks (>=256 rows/block for
    # the 256-wide v6e/v7x MXU, 'arbitrary' reduction axis accumulating the
    # scatter-add into a VMEM scratch) plus a leading 'parallel' axis to use
    # v7x's second TensorCore, with index-based gather/scatter via
    # PrefetchScalarGridSpec instead of dense one-hots.
    out = pl.pallas_call(
        _make_kernel(num_extra),
        out_shape=jax.ShapeDtypeStruct((B, Hp), jnp.float32),
        in_specs=[vmem] * 8,
        out_specs=vmem,
        compiler_params=pltpu.CompilerParams(vmem_limit_bytes=8 * 1024 * 1024),
    )(x, edge_pos, src_oh, tgt_oh, pool_oh, Wz, W_stack, b_stack)
    return out[:, :num_classes]          # drop padded class lanes


# ----------------------------------------------------------------------------
# Host-side parameter folding / padding and input preparation
# ----------------------------------------------------------------------------
def fold_and_pad_params(p, F, H, Z, num_extra):
    """Fold eval-mode BatchNorms into the adjacent Linears, zero-pad F->Fp and
    H->Hp (multiples of 128), Z->Zp (multiple of 256), and pack everything into
    three arrays: Wz [Zp,Hp] bf16, W_stack [nW,Hp,Hp] bf16, b_stack [nB,Hp] f32."""
    Hp = _round_up(H, LANE)
    Fp = _round_up(F, LANE)
    assert Fp == Hp, "consolidated weight slab assumes Fp == Hp"
    Zp = _round_up(Z, 2 * LANE)

    def pad_to(a, shape):
        return jnp.pad(a, [(0, t - s) for s, t in zip(a.shape, shape)])

    # BN(x) = x*scale + shift with scale = g*rsqrt(v+eps), shift = b - m*scale.
    s1 = p["g1"] * lax.rsqrt(p["v1"] + BN_EPS)
    t1 = p["b1"] - p["m1"] * s1
    s2 = p["g2"] * lax.rsqrt(p["v2"] + BN_EPS)
    t2 = p["b2"] - p["m2"] * s2

    Wz = pad_to(p["Wz"] * s1, (Zp, Hp)).astype(jnp.bfloat16)   # embedding + BN1

    widx, nW = _w_index(num_extra)
    bidx, nB = _b_index(num_extra)
    W_stack = np.zeros((nW, Hp, Hp), np.float32)
    b_stack = np.zeros((nB, Hp), np.float32)

    def putW(name, mat):
        mat = np.asarray(mat)
        W_stack[widx[name], :mat.shape[0], :mat.shape[1]] = mat

    def putB(name, vec):
        vec = np.asarray(vec).reshape(-1)
        b_stack[bidx[name], :vec.shape[0]] = vec

    putW("Wz2", p["Wz2"] * s2)
    putB("bz1", t1)
    putB("bz2", p["bz2"] * s2 + t2)
    putW("We1", p["We1"]); putB("bedge1", p["bedge1"])
    putW("W1a", p["W1a"]); putB("b1a", p["b1a"])
    putW("W1b", p["W1b"]); putB("b1b", p["b1b"])
    for l in range(num_extra):
        putW(f"WeL{l}", p["WeL"][l]); putB(f"beL{l}", p["beL"][l])
        putW(f"WLa{l}", p["WLa"][l]); putB(f"bLa{l}", p["bLa"][l])
        putW(f"WLb{l}", p["WLb"][l]); putB(f"bLb{l}", p["bLb"][l])
    putW("Wl1", p["Wl1"]); putB("bl1", p["bl1"])
    putW("Wl2", p["Wl2"])
    # Padded class lanes get a -1e30 bias so the in-kernel log_softmax ignores them.
    bl2 = np.full((Hp,), -1e30, np.float32)
    bl2[:H] = np.asarray(p["bl2"]).reshape(-1)
    b_stack[bidx["bl2"]] = bl2

    kparams = (Wz, jnp.asarray(W_stack, jnp.bfloat16), jnp.asarray(b_stack, jnp.float32))
    return kparams, Zp, Fp, Hp


def prepare_inputs(x, edge_pos, src_oh, tgt_oh, pool_oh, Zp, Fp):
    """Zero-pad edge_pos to Zp and x to Fp; cast all 0/1 operands to bf16 (exact)."""
    bf16 = jnp.bfloat16
    x_p = jnp.pad(x, ((0, 0), (0, Fp - x.shape[1])))
    edge_pos_p = jnp.pad(edge_pos, ((0, 0), (0, Zp - edge_pos.shape[1])))
    return (x_p.astype(bf16), edge_pos_p.astype(bf16),
            src_oh.astype(bf16), tgt_oh.astype(bf16), pool_oh.astype(bf16))


# ----------------------------------------------------------------------------
# Pure-JAX reference (high precision) mirroring the PyTorch semantics
# ----------------------------------------------------------------------------
def reference_forward(inputs, params, num_extra):
    x, edge_pos, src_oh, tgt_oh, pool_oh = inputs
    dot = functools.partial(jnp.dot, precision=lax.Precision.HIGHEST)

    z = dot(edge_pos, params["Wz"])
    z = _bn_eval(z, params["g1"], params["b1"], params["m1"], params["v1"])
    z = jnp.maximum(z, 0.0)
    z = dot(z, params["Wz2"]) + params["bz2"]
    z = _bn_eval(z, params["g2"], params["b2"], params["m2"], params["v2"])
    z = jnp.maximum(z, 0.0)

    def gine(x, We, be, Wa, ba, Wb, bb):
        e = dot(z, We) + be
        msg = jnp.maximum(dot(src_oh, x) + e, 0.0)
        h = dot(tgt_oh, msg) + x
        h = jnp.maximum(dot(h, Wa) + ba, 0.0)
        h = jnp.maximum(dot(h, Wb) + bb, 0.0)
        return h

    x = gine(x, params["We1"], params["bedge1"],
             params["W1a"], params["b1a"], params["W1b"], params["b1b"])
    for l in range(num_extra):
        x = gine(x, params["WeL"][l], params["beL"][l],
                 params["WLa"][l], params["bLa"][l], params["WLb"][l], params["bLb"][l])

    p = dot(pool_oh, x)
    p = jnp.maximum(dot(p, params["Wl1"]) + params["bl1"], 0.0)
    p = dot(p, params["Wl2"]) + params["bl2"]
    return jax.nn.log_softmax(p, axis=1)


def init_params(key, F, H, Z, num_extra):
    keys = iter(jax.random.split(key, 64))

    def lin(fan_in, fan_out):
        W = jax.random.normal(next(keys), (fan_in, fan_out), jnp.float32) / np.sqrt(fan_in)
        b = 0.01 * jax.random.normal(next(keys), (1, fan_out), jnp.float32)
        return W, b

    p = {}
    # z_initial embedding table (scaled for numerical tameness)
    p["Wz"] = jax.random.normal(next(keys), (Z, H), jnp.float32) / np.sqrt(Z)
    # BatchNorm1d defaults (gamma=1, beta=0, running_mean=0, running_var=1)
    for pref in ("1", "2"):
        p["g" + pref] = jnp.ones((1, H), jnp.float32)
        p["b" + pref] = jnp.zeros((1, H), jnp.float32)
        p["m" + pref] = jnp.zeros((1, H), jnp.float32)
        p["v" + pref] = jnp.ones((1, H), jnp.float32)
    p["Wz2"], p["bz2"] = lin(H, H)

    # conv1: edge lin H->F, MLP F->H->H
    p["We1"], p["bedge1"] = lin(H, F)
    p["W1a"], p["b1a"] = lin(F, H)
    p["W1b"], p["b1b"] = lin(H, H)

    # extra convs (stacked along leading axis)
    WeL, beL, WLa, bLa, WLb, bLb = [], [], [], [], [], []
    for _ in range(num_extra):
        w, b = lin(H, H); WeL.append(w); beL.append(b)
        w, b = lin(H, H); WLa.append(w); bLa.append(b)
        w, b = lin(H, H); WLb.append(w); bLb.append(b)
    p["WeL"], p["beL"] = jnp.stack(WeL), jnp.stack(beL)
    p["WLa"], p["bLa"] = jnp.stack(WLa), jnp.stack(bLa)
    p["WLb"], p["bLb"] = jnp.stack(WLb), jnp.stack(bLb)

    p["Wl1"], p["bl1"] = lin(H, H)
    p["Wl2"], p["bl2"] = lin(H, H)
    return p


if __name__ == "__main__":
    # Small synthetic graph batch consistent with the module:
    # 2 graphs, 8 nodes each (N=16), 24 directed edges, 2 one-hot node features,
    # hidden=32, z-table size 1800, num_layers=3.
    N, E, B, F, H, Z = 16, 24, 2, 2, 32, 1800
    NUM_LAYERS = 3
    num_extra = NUM_LAYERS - 1

    key = jax.random.PRNGKey(0)
    k_lab, k_e, k_pos, k_par = jax.random.split(key, 4)

    labels = jax.random.randint(k_lab, (N,), 0, 2)
    x = jax.nn.one_hot(labels, F, dtype=jnp.float32)               # data.x (one-hot)

    # edges kept within each graph (graph0 = nodes 0..7, graph1 = nodes 8..15)
    k0, k1, k2, k3 = jax.random.split(k_e, 4)
    half, ng = E // 2, N // 2
    src = jnp.concatenate([jax.random.randint(k0, (half,), 0, ng),
                           ng + jax.random.randint(k1, (half,), 0, ng)])
    dst = jnp.concatenate([jax.random.randint(k2, (half,), 0, ng),
                           ng + jax.random.randint(k3, (half,), 0, ng)])
    batch = jnp.concatenate([jnp.zeros(ng, jnp.int32), jnp.ones(ng, jnp.int32)])

    # sparse multi-hot edge positional encoding (data.edge_pos)
    edge_pos = (jax.random.uniform(k_pos, (E, Z)) < 0.05).astype(jnp.float32)

    # dense one-hot operators for gather / scatter-add / global_add_pool (glue)
    src_oh = jax.nn.one_hot(src, N, dtype=jnp.float32)             # [E, N]
    tgt_oh = jax.nn.one_hot(dst, N, dtype=jnp.float32).T           # [N, E]
    pool_oh = jax.nn.one_hot(batch, B, dtype=jnp.float32).T        # [B, N]

    raw_params = init_params(k_par, F, H, Z, num_extra)

    # Kernel-side: BN folded, F/H/Z padded, weights bf16, 0/1 operands bf16,
    # everything packed into 3 arrays (Wz, W_stack, b_stack).
    kparams, Zp, Fp, Hp = fold_and_pad_params(raw_params, F, H, Z, num_extra)
    kinputs = prepare_inputs(x, edge_pos, src_oh, tgt_oh, pool_oh, Zp, Fp)

    out = nested_gin_forward(kinputs, kparams, num_extra, num_classes=H)
    out = jax.block_until_ready(out)

    ref = reference_forward((x, edge_pos, src_oh, tgt_oh, pool_oh), raw_params, num_extra)
    # Kernel uses bf16 weights + bf16 activation operands on the MXU (f32
    # accumulate, f32 elementwise) vs the f32 HIGHEST reference; the tolerance
    # covers ~10 sequential bf16 matmul stages at these scales.
    np.testing.assert_allclose(np.asarray(out), np.asarray(ref), rtol=1e-1, atol=5e-2)

    print("KERNEL_OK")
</pallas_src>

<mosaic_0001>
module attributes {stable_mosaic.version = 11 : i64} {
  func.func @kernel(%arg0: memref<16x128xbf16, #tpu.memory_space<vmem>>, %arg1: memref<24x2048xbf16, #tpu.memory_space<vmem>>, %arg2: memref<24x16xbf16, #tpu.memory_space<vmem>>, %arg3: memref<16x24xbf16, #tpu.memory_space<vmem>>, %arg4: memref<2x16xbf16, #tpu.memory_space<vmem>>, %arg5: memref<2048x128xbf16, #tpu.memory_space<vmem>>, %arg6: memref<12x128x128xbf16, #tpu.memory_space<vmem>>, %arg7: memref<13x128xf32, #tpu.memory_space<vmem>>, %arg8: memref<2x128xf32, #tpu.memory_space<vmem>>) attributes {dimension_semantics = [], scalar_prefetch = 0 : i64, scratch_operands = 0 : i64, tpu.core_type = #tpu.core_type<tc>} {
    %c0 = arith.constant 0 : index
    %c0_0 = arith.constant 0 : index
    %0 = vector.load %arg1[%c0, %c0_0] : memref<24x2048xbf16, #tpu.memory_space<vmem>>, vector<24x2048xbf16>
    %c0_1 = arith.constant 0 : index
    %c0_2 = arith.constant 0 : index
    %1 = vector.load %arg5[%c0_1, %c0_2] : memref<2048x128xbf16, #tpu.memory_space<vmem>>, vector<2048x128xbf16>
    %cst = arith.constant dense<0.000000e+00> : vector<24x128xf32>
    %2 = tpu.matmul %0, %1, %cst {dimension_numbers = #tpu.dot_dimension_numbers<[1], [0], [0], [1], [0, 0, 1, 1], [], []>} : vector<24x2048xbf16>, vector<2048x128xbf16>, vector<24x128xf32> -> vector<24x128xf32>
    %c0_3 = arith.constant 0 : index
    %c0_4 = arith.constant 0 : index
    %3 = vector.load %arg7[%c0_3, %c0_4] : memref<13x128xf32, #tpu.memory_space<vmem>>, vector<1x128xf32>
    %4 = vector.broadcast %3 : vector<1x128xf32> to vector<24x128xf32>
    %5 = arith.addf %2, %4 : vector<24x128xf32>
    %cst_5 = arith.constant 0.000000e+00 : f32
    %6 = vector.broadcast %cst_5 : f32 to vector<24x128xf32>
    %7 = arith.maximumf %5, %6 : vector<24x128xf32>
    %8 = arith.truncf %7 : vector<24x128xf32> to vector<24x128xbf16>
    %c0_6 = arith.constant 0 : index
    %c0_7 = arith.constant 0 : index
    %c0_8 = arith.constant 0 : index
    %9 = vector.load %arg6[%c0_6, %c0_7, %c0_8] : memref<12x128x128xbf16, #tpu.memory_space<vmem>>, vector<1x128x128xbf16>
    %10 = vector.shape_cast %9 : vector<1x128x128xbf16> to vector<128x128xbf16>
    %cst_9 = arith.constant dense<0.000000e+00> : vector<24x128xf32>
    %11 = tpu.matmul %8, %10, %cst_9 {dimension_numbers = #tpu.dot_dimension_numbers<[1], [0], [0], [1], [0, 0, 1, 1], [], []>} : vector<24x128xbf16>, vector<128x128xbf16>, vector<24x128xf32> -> vector<24x128xf32>
    %c1 = arith.constant 1 : index
    %c0_10 = arith.constant 0 : index
    %12 = vector.load %arg7[%c1, %c0_10] : memref<13x128xf32, #tpu.memory_space<vmem>>, vector<1x128xf32>
    %13 = vector.broadcast %12 : vector<1x128xf32> to vector<24x128xf32>
    %14 = arith.addf %11, %13 : vector<24x128xf32>
    %cst_11 = arith.constant 0.000000e+00 : f32
    %15 = vector.broadcast %cst_11 : f32 to vector<24x128xf32>
    %16 = arith.maximumf %14, %15 : vector<24x128xf32>
    %17 = arith.truncf %16 : vector<24x128xf32> to vector<24x128xbf16>
    %c0_12 = arith.constant 0 : index
    %c0_13 = arith.constant 0 : index
    %18 = vector.load %arg2[%c0_12, %c0_13] : memref<24x16xbf16, #tpu.memory_space<vmem>>, vector<24x16xbf16>
    %c0_14 = arith.constant 0 : index
    %c0_15 = arith.constant 0 : index
    %19 = vector.load %arg3[%c0_14, %c0_15] : memref<16x24xbf16, #tpu.memory_space<vmem>>, vector<16x24xbf16>
    %c0_16 = arith.constant 0 : index
    %c0_17 = arith.constant 0 : index
    %20 = vector.load %arg0[%c0_16, %c0_17] : memref<16x128xbf16, #tpu.memory_space<vmem>>, vector<16x128xbf16>
    %21 = arith.extf %20 : vector<16x128xbf16> to vector<16x128xf32>
    %c1_18 = arith.constant 1 : index
    %c0_19 = arith.constant 0 : index
    %c0_20 = arith.constant 0 : index
    %22 = vector.load %arg6[%c1_18, %c0_19, %c0_20] : memref<12x128x128xbf16, #tpu.memory_space<vmem>>, vector<1x128x128xbf16>
    %23 = vector.shape_cast %22 : vector<1x128x128xbf16> to vector<128x128xbf16>
    %c2 = arith.constant 2 : index
    %c0_21 = arith.constant 0 : index
    %24 = vector.load %arg7[%c2, %c0_21] : memref<13x128xf32, #tpu.memory_space<vmem>>, vector<1x128xf32>
    %c2_22 = arith.constant 2 : index
    %c0_23 = arith.constant 0 : index
    %c0_24 = arith.constant 0 : index
    %25 = vector.load %arg6[%c2_22, %c0_23, %c0_24] : memref<12x128x128xbf16, #tpu.memory_space<vmem>>, vector<1x128x128xbf16>
    %26 = vector.shape_cast %25 : vector<1x128x128xbf16> to vector<128x128xbf16>
    %c3 = arith.constant 3 : index
    %c0_25 = arith.constant 0 : index
    %27 = vector.load %arg7[%c3, %c0_25] : memref<13x128xf32, #tpu.memory_space<vmem>>, vector<1x128xf32>
    %c3_26 = arith.constant 3 : index
    %c0_27 = arith.constant 0 : index
    %c0_28 = arith.constant 0 : index
    %28 = vector.load %arg6[%c3_26, %c0_27, %c0_28] : memref<12x128x128xbf16, #tpu.memory_space<vmem>>, vector<1x128x128xbf16>
    %29 = vector.shape_cast %28 : vector<1x128x128xbf16> to vector<128x128xbf16>
    %c4 = arith.constant 4 : index
    %c0_29 = arith.constant 0 : index
    %30 = vector.load %arg7[%c4, %c0_29] : memref<13x128xf32, #tpu.memory_space<vmem>>, vector<1x128xf32>
    %cst_30 = arith.constant dense<0.000000e+00> : vector<24x128xf32>
    %31 = tpu.matmul %17, %23, %cst_30 {dimension_numbers = #tpu.dot_dimension_numbers<[1], [0], [0], [1], [0, 0, 1, 1], [], []>} : vector<24x128xbf16>, vector<128x128xbf16>, vector<24x128xf32> -> vector<24x128xf32>
    %32 = vector.broadcast %24 : vector<1x128xf32> to vector<24x128xf32>
    %33 = arith.addf %31, %32 : vector<24x128xf32>
    %34 = arith.truncf %21 : vector<16x128xf32> to vector<16x128xbf16>
    %cst_31 = arith.constant dense<0.000000e+00> : vector<24x128xf32>
    %35 = tpu.matmul %18, %34, %cst_31 {dimension_numbers = #tpu.dot_dimension_numbers<[1], [0], [0], [1], [0, 0, 1, 1], [], []>} : vector<24x16xbf16>, vector<16x128xbf16>, vector<24x128xf32> -> vector<24x128xf32>
    %36 = arith.addf %35, %33 : vector<24x128xf32>
    %cst_32 = arith.constant 0.000000e+00 : f32
    %37 = vector.broadcast %cst_32 : f32 to vector<24x128xf32>
    %38 = arith.maximumf %36, %37 : vector<24x128xf32>
    %39 = arith.truncf %38 : vector<24x128xf32> to vector<24x128xbf16>
    %cst_33 = arith.constant dense<0.000000e+00> : vector<16x128xf32>
    %40 = tpu.matmul %19, %39, %cst_33 {dimension_numbers = #tpu.dot_dimension_numbers<[1], [0], [0], [1], [0, 0, 1, 1], [], []>} : vector<16x24xbf16>, vector<24x128xbf16>, vector<16x128xf32> -> vector<16x128xf32>
    %41 = arith.addf %40, %21 : vector<16x128xf32>
    %42 = arith.truncf %41 : vector<16x128xf32> to vector<16x128xbf16>
    %cst_34 = arith.constant dense<0.000000e+00> : vector<16x128xf32>
    %43 = tpu.matmul %42, %26, %cst_34 {dimension_numbers = #tpu.dot_dimension_numbers<[1], [0], [0], [1], [0, 0, 1, 1], [], []>} : vector<16x128xbf16>, vector<128x128xbf16>, vector<16x128xf32> -> vector<16x128xf32>
    %44 = vector.broadcast %27 : vector<1x128xf32> to vector<16x128xf32>
    %45 = arith.addf %43, %44 : vector<16x128xf32>
    %cst_35 = arith.constant 0.000000e+00 : f32
    %46 = vector.broadcast %cst_35 : f32 to vector<16x128xf32>
    %47 = arith.maximumf %45, %46 : vector<16x128xf32>
    %48 = arith.truncf %47 : vector<16x128xf32> to vector<16x128xbf16>
    %cst_36 = arith.constant dense<0.000000e+00> : vector<16x128xf32>
    %49 = tpu.matmul %48, %29, %cst_36 {dimension_numbers = #tpu.dot_dimension_numbers<[1], [0], [0], [1], [0, 0, 1, 1], [], []>} : vector<16x128xbf16>, vector<128x128xbf16>, vector<16x128xf32> -> vector<16x128xf32>
    %50 = vector.broadcast %30 : vector<1x128xf32> to vector<16x128xf32>
    %51 = arith.addf %49, %50 : vector<16x128xf32>
    %cst_37 = arith.constant 0.000000e+00 : f32
    %52 = vector.broadcast %cst_37 : f32 to vector<16x128xf32>
    %53 = arith.maximumf %51, %52 : vector<16x128xf32>
    %c6 = arith.constant 6 : index
    %c0_38 = arith.constant 0 : index
    %c0_39 = arith.constant 0 : index
    %54 = vector.load %arg6[%c6, %c0_38, %c0_39] : memref<12x128x128xbf16, #tpu.memory_space<vmem>>, vector<1x128x128xbf16>
    %55 = vector.shape_cast %54 : vector<1x128x128xbf16> to vector<128x128xbf16>
    %c7 = arith.constant 7 : index
    %c0_40 = arith.constant 0 : index
    %56 = vector.load %arg7[%c7, %c0_40] : memref<13x128xf32, #tpu.memory_space<vmem>>, vector<1x128xf32>
    %c7_41 = arith.constant 7 : index
    %c0_42 = arith.constant 0 : index
    %c0_43 = arith.constant 0 : index
    %57 = vector.load %arg6[%c7_41, %c0_42, %c0_43] : memref<12x128x128xbf16, #tpu.memory_space<vmem>>, vector<1x128x128xbf16>
    %58 = vector.shape_cast %57 : vector<1x128x128xbf16> to vector<128x128xbf16>
    %c8 = arith.constant 8 : index
    %c0_44 = arith.constant 0 : index
    %59 = vector.load %arg7[%c8, %c0_44] : memref<13x128xf32, #tpu.memory_space<vmem>>, vector<1x128xf32>
    %c8_45 = arith.constant 8 : index
    %c0_46 = arith.constant 0 : index
    %c0_47 = arith.constant 0 : index
    %60 = vector.load %arg6[%c8_45, %c0_46, %c0_47] : memref<12x128x128xbf16, #tpu.memory_space<vmem>>, vector<1x128x128xbf16>
    %61 = vector.shape_cast %60 : vector<1x128x128xbf16> to vector<128x128xbf16>
    %c9 = arith.constant 9 : index
    %c0_48 = arith.constant 0 : index
    %62 = vector.load %arg7[%c9, %c0_48] : memref<13x128xf32, #tpu.memory_space<vmem>>, vector<1x128xf32>
    %cst_49 = arith.constant dense<0.000000e+00> : vector<24x128xf32>
    %63 = tpu.matmul %17, %55, %cst_49 {dimension_numbers = #tpu.dot_dimension_numbers<[1], [0], [0], [1], [0, 0, 1, 1], [], []>} : vector<24x128xbf16>, vector<128x128xbf16>, vector<24x128xf32> -> vector<24x128xf32>
    %64 = vector.broadcast %56 : vector<1x128xf32> to vector<24x128xf32>
    %65 = arith.addf %63, %64 : vector<24x128xf32>
    %66 = arith.truncf %53 : vector<16x128xf32> to vector<16x128xbf16>
    %cst_50 = arith.constant dense<0.000000e+00> : vector<24x128xf32>
    %67 = tpu.matmul %18, %66, %cst_50 {dimension_numbers = #tpu.dot_dimension_numbers<[1], [0], [0], [1], [0, 0, 1, 1], [], []>} : vector<24x16xbf16>, vector<16x128xbf16>, vector<24x128xf32> -> vector<24x128xf32>
    %68 = arith.addf %67, %65 : vector<24x128xf32>
    %cst_51 = arith.constant 0.000000e+00 : f32
    %69 = vector.broadcast %cst_51 : f32 to vector<24x128xf32>
    %70 = arith.maximumf %68, %69 : vector<24x128xf32>
    %71 = arith.truncf %70 : vector<24x128xf32> to vector<24x128xbf16>
    %cst_52 = arith.constant dense<0.000000e+00> : vector<16x128xf32>
    %72 = tpu.matmul %19, %71, %cst_52 {dimension_numbers = #tpu.dot_dimension_numbers<[1], [0], [0], [1], [0, 0, 1, 1], [], []>} : vector<16x24xbf16>, vector<24x128xbf16>, vector<16x128xf32> -> vector<16x128xf32>
    %73 = arith.addf %72, %53 : vector<16x128xf32>
    %74 = arith.truncf %73 : vector<16x128xf32> to vector<16x128xbf16>
    %cst_53 = arith.constant dense<0.000000e+00> : vector<16x128xf32>
    %75 = tpu.matmul %74, %58, %cst_53 {dimension_numbers = #tpu.dot_dimension_numbers<[1], [0], [0], [1], [0, 0, 1, 1], [], []>} : vector<16x128xbf16>, vector<128x128xbf16>, vector<16x128xf32> -> vector<16x128xf32>
    %76 = vector.broadcast %59 : vector<1x128xf32> to vector<16x128xf32>
    %77 = arith.addf %75, %76 : vector<16x128xf32>
    %cst_54 = arith.constant 0.000000e+00 : f32
    %78 = vector.broadcast %cst_54 : f32 to vector<16x128xf32>
    %79 = arith.maximumf %77, %78 : vector<16x128xf32>
    %80 = arith.truncf %79 : vector<16x128xf32> to vector<16x128xbf16>
    %cst_55 = arith.constant dense<0.000000e+00> : vector<16x128xf32>
    %81 = tpu.matmul %80, %61, %cst_55 {dimension_numbers = #tpu.dot_dimension_numbers<[1], [0], [0], [1], [0, 0, 1, 1], [], []>} : vector<16x128xbf16>, vector<128x128xbf16>, vector<16x128xf32> -> vector<16x128xf32>
    %82 = vector.broadcast %62 : vector<1x128xf32> to vector<16x128xf32>
    %83 = arith.addf %81, %82 : vector<16x128xf32>
    %cst_56 = arith.constant 0.000000e+00 : f32
    %84 = vector.broadcast %cst_56 : f32 to vector<16x128xf32>
    %85 = arith.maximumf %83, %84 : vector<16x128xf32>
    %c9_57 = arith.constant 9 : index
    %c0_58 = arith.constant 0 : index
    %c0_59 = arith.constant 0 : index
    %86 = vector.load %arg6[%c9_57, %c0_58, %c0_59] : memref<12x128x128xbf16, #tpu.memory_space<vmem>>, vector<1x128x128xbf16>
    %87 = vector.shape_cast %86 : vector<1x128x128xbf16> to vector<128x128xbf16>
    %c10 = arith.constant 10 : index
    %c0_60 = arith.constant 0 : index
    %88 = vector.load %arg7[%c10, %c0_60] : memref<13x128xf32, #tpu.memory_space<vmem>>, vector<1x128xf32>
    %c10_61 = arith.constant 10 : index
    %c0_62 = arith.constant 0 : index
    %c0_63 = arith.constant 0 : index
    %89 = vector.load %arg6[%c10_61, %c0_62, %c0_63] : memref<12x128x128xbf16, #tpu.memory_space<vmem>>, vector<1x128x128xbf16>
    %90 = vector.shape_cast %89 : vector<1x128x128xbf16> to vector<128x128xbf16>
    %c11 = arith.constant 11 : index
    %c0_64 = arith.constant 0 : index
    %91 = vector.load %arg7[%c11, %c0_64] : memref<13x128xf32, #tpu.memory_space<vmem>>, vector<1x128xf32>
    %c11_65 = arith.constant 11 : index
    %c0_66 = arith.constant 0 : index
    %c0_67 = arith.constant 0 : index
    %92 = vector.load %arg6[%c11_65, %c0_66, %c0_67] : memref<12x128x128xbf16, #tpu.memory_space<vmem>>, vector<1x128x128xbf16>
    %93 = vector.shape_cast %92 : vector<1x128x128xbf16> to vector<128x128xbf16>
    %c12 = arith.constant 12 : index
    %c0_68 = arith.constant 0 : index
    %94 = vector.load %arg7[%c12, %c0_68] : memref<13x128xf32, #tpu.memory_space<vmem>>, vector<1x128xf32>
    %cst_69 = arith.constant dense<0.000000e+00> : vector<24x128xf32>
    %95 = tpu.matmul %17, %87, %cst_69 {dimension_numbers = #tpu.dot_dimension_numbers<[1], [0], [0], [1], [0, 0, 1, 1], [], []>} : vector<24x128xbf16>, vector<128x128xbf16>, vector<24x128xf32> -> vector<24x128xf32>
    %96 = vector.broadcast %88 : vector<1x128xf32> to vector<24x128xf32>
    %97 = arith.addf %95, %96 : vector<24x128xf32>
    %98 = arith.truncf %85 : vector<16x128xf32> to vector<16x128xbf16>
    %cst_70 = arith.constant dense<0.000000e+00> : vector<24x128xf32>
    %99 = tpu.matmul %18, %98, %cst_70 {dimension_numbers = #tpu.dot_dimension_numbers<[1], [0], [0], [1], [0, 0, 1, 1], [], []>} : vector<24x16xbf16>, vector<16x128xbf16>, vector<24x128xf32> -> vector<24x128xf32>
    %100 = arith.addf %99, %97 : vector<24x128xf32>
    %cst_71 = arith.constant 0.000000e+00 : f32
    %101 = vector.broadcast %cst_71 : f32 to vector<24x128xf32>
    %102 = arith.maximumf %100, %101 : vector<24x128xf32>
    %103 = arith.truncf %102 : vector<24x128xf32> to vector<24x128xbf16>
    %cst_72 = arith.constant dense<0.000000e+00> : vector<16x128xf32>
    %104 = tpu.matmul %19, %103, %cst_72 {dimension_numbers = #tpu.dot_dimension_numbers<[1], [0], [0], [1], [0, 0, 1, 1], [], []>} : vector<16x24xbf16>, vector<24x128xbf16>, vector<16x128xf32> -> vector<16x128xf32>
    %105 = arith.addf %104, %85 : vector<16x128xf32>
    %106 = arith.truncf %105 : vector<16x128xf32> to vector<16x128xbf16>
    %cst_73 = arith.constant dense<0.000000e+00> : vector<16x128xf32>
    %107 = tpu.matmul %106, %90, %cst_73 {dimension_numbers = #tpu.dot_dimension_numbers<[1], [0], [0], [1], [0, 0, 1, 1], [], []>} : vector<16x128xbf16>, vector<128x128xbf16>, vector<16x128xf32> -> vector<16x128xf32>
    %108 = vector.broadcast %91 : vector<1x128xf32> to vector<16x128xf32>
    %109 = arith.addf %107, %108 : vector<16x128xf32>
    %cst_74 = arith.constant 0.000000e+00 : f32
    %110 = vector.broadcast %cst_74 : f32 to vector<16x128xf32>
    %111 = arith.maximumf %109, %110 : vector<16x128xf32>
    %112 = arith.truncf %111 : vector<16x128xf32> to vector<16x128xbf16>
    %cst_75 = arith.constant dense<0.000000e+00> : vector<16x128xf32>
    %113 = tpu.matmul %112, %93, %cst_75 {dimension_numbers = #tpu.dot_dimension_numbers<[1], [0], [0], [1], [0, 0, 1, 1], [], []>} : vector<16x128xbf16>, vector<128x128xbf16>, vector<16x128xf32> -> vector<16x128xf32>
    %114 = vector.broadcast %94 : vector<1x128xf32> to vector<16x128xf32>
    %115 = arith.addf %113, %114 : vector<16x128xf32>
    %cst_76 = arith.constant 0.000000e+00 : f32
    %116 = vector.broadcast %cst_76 : f32 to vector<16x128xf32>
    %117 = arith.maximumf %115, %116 : vector<16x128xf32>
    %c0_77 = arith.constant 0 : index
    %c0_78 = arith.constant 0 : index
    %118 = vector.load %arg4[%c0_77, %c0_78] : memref<2x16xbf16, #tpu.memory_space<vmem>>, vector<2x16xbf16>
    %119 = arith.truncf %117 : vector<16x128xf32> to vector<16x128xbf16>
    %cst_79 = arith.constant dense<0.000000e+00> : vector<2x128xf32>
    %120 = tpu.matmul %118, %119, %cst_79 {dimension_numbers = #tpu.dot_dimension_numbers<[1], [0], [0], [1], [0, 0, 1, 1], [], []>} : vector<2x16xbf16>, vector<16x128xbf16>, vector<2x128xf32> -> vector<2x128xf32>
    %121 = arith.truncf %120 : vector<2x128xf32> to vector<2x128xbf16>
    %c4_80 = arith.constant 4 : index
    %c0_81 = arith.constant 0 : index
    %c0_82 = arith.constant 0 : index
    %122 = vector.load %arg6[%c4_80, %c0_81, %c0_82] : memref<12x128x128xbf16, #tpu.memory_space<vmem>>, vector<1x128x128xbf16>
    %123 = vector.shape_cast %122 : vector<1x128x128xbf16> to vector<128x128xbf16>
    %cst_83 = arith.constant dense<0.000000e+00> : vector<2x128xf32>
    %124 = tpu.matmul %121, %123, %cst_83 {dimension_numbers = #tpu.dot_dimension_numbers<[1], [0], [0], [1], [0, 0, 1, 1], [], []>} : vector<2x128xbf16>, vector<128x128xbf16>, vector<2x128xf32> -> vector<2x128xf32>
    %c5 = arith.constant 5 : index
    %c0_84 = arith.constant 0 : index
    %125 = vector.load %arg7[%c5, %c0_84] : memref<13x128xf32, #tpu.memory_space<vmem>>, vector<1x128xf32>
    %126 = vector.broadcast %125 : vector<1x128xf32> to vector<2x128xf32>
    %127 = arith.addf %124, %126 : vector<2x128xf32>
    %cst_85 = arith.constant 0.000000e+00 : f32
    %128 = vector.broadcast %cst_85 : f32 to vector<2x128xf32>
    %129 = arith.maximumf %127, %128 : vector<2x128xf32>
    %130 = arith.truncf %129 : vector<2x128xf32> to vector<2x128xbf16>
    %c5_86 = arith.constant 5 : index
    %c0_87 = arith.constant 0 : index
    %c0_88 = arith.constant 0 : index
    %131 = vector.load %arg6[%c5_86, %c0_87, %c0_88] : memref<12x128x128xbf16, #tpu.memory_space<vmem>>, vector<1x128x128xbf16>
    %132 = vector.shape_cast %131 : vector<1x128x128xbf16> to vector<128x128xbf16>
    %cst_89 = arith.constant dense<0.000000e+00> : vector<2x128xf32>
    %133 = tpu.matmul %130, %132, %cst_89 {dimension_numbers = #tpu.dot_dimension_numbers<[1], [0], [0], [1], [0, 0, 1, 1], [], []>} : vector<2x128xbf16>, vector<128x128xbf16>, vector<2x128xf32> -> vector<2x128xf32>
    %c6_90 = arith.constant 6 : index
    %c0_91 = arith.constant 0 : index
    %134 = vector.load %arg7[%c6_90, %c0_91] : memref<13x128xf32, #tpu.memory_space<vmem>>, vector<1x128xf32>
    %135 = vector.broadcast %134 : vector<1x128xf32> to vector<2x128xf32>
    %136 = arith.addf %133, %135 : vector<2x128xf32>
    %cst_92 = arith.constant dense<0xFF800000> : vector<2xf32>
    %137 = vector.multi_reduction <maximumf>, %136, %cst_92 [1] : vector<2x128xf32> to vector<2xf32>
    %138 = vector.shape_cast %137 : vector<2xf32> to vector<2x1xf32>
    %139 = vector.broadcast %138 : vector<2x1xf32> to vector<2x128xf32>
    %140 = arith.subf %136, %139 : vector<2x128xf32>
    %141 = math.exp %140 : vector<2x128xf32>
    %cst_93 = arith.constant dense<0.000000e+00> : vector<2xf32>
    %142 = vector.multi_reduction <add>, %141, %cst_93 [1] : vector<2x128xf32> to vector<2xf32>
    %143 = vector.shape_cast %142 : vector<2xf32> to vector<2x1xf32>
    %144 = math.log %143 : vector<2x1xf32>
    %145 = vector.broadcast %144 : vector<2x1xf32> to vector<2x128xf32>
    %146 = arith.subf %140, %145 : vector<2x128xf32>
    %c0_94 = arith.constant 0 : index
    %c0_95 = arith.constant 0 : index
    %147 = vector.load %arg8[%c0_94, %c0_95] : memref<2x128xf32, #tpu.memory_space<vmem>>, vector<2x128xf32>
    tpu.vector_store %arg8[%c0_94, %c0_95], %146 {strides = array<i32>} : memref<2x128xf32, #tpu.memory_space<vmem>>, vector<2x128xf32>,
    return
  }
}

</mosaic_0001>

<bundles_post_ra>
// kernel: tpu_custom_call.1
= control target key start
LH: loop header
LB: loop body
LE: loop exit
PB: predicated region body
PF: predicated region fallthrough
CT: control target
= control target key end

     0   :  { %13 = vsyncpa [#allocation3], 0  ;;  %s5124_s0 = inlined_call_operand.vmem [shape: bf16[16,128], index: 0, kind: input, shape index: {}]   ;;  %s5125_s1 = inlined_call_operand.hbm [shape: bf16[24,2048], index: 1, kind: input, shape index: {}]   ;;  %s5126_s2 = inlined_call_operand.vmem [shape: bf16[24,16], index: 2, kind: input, shape index: {}]   ;;  %s5127_s3 = inlined_call_operand.hbm [shape: bf16[16,24], index: 3, kind: input, shape index: {}]   ;;  %s5128_s4 = inlined_call_operand.vmem [shape: bf16[2,16], index: 4, kind: input, shape index: {}]   ;;  %s5129_s5 = inlined_call_operand.hbm [shape: bf16[2048,128], index: 5, kind: input, shape index: {}]   ;;  %s5130_s6 = inlined_call_operand.hbm [shape: bf16[12,128,128], index: 6, kind: input, shape index: {}]   ;;  %s5131_s7 = inlined_call_operand.vmem [shape: f32[13,128], index: 7, kind: input, shape index: {}]   ;;  %s5132_s8 = inlined_call_operand.hbm [shape: f32[2,128], index: 8, kind: output, shape index: {}]  }
   0x1   :  { %14 = vsyncpa [#allocation6], 0 }
   0x2   :  { %15 = vsyncpa [#allocation9], 0 }
   0x3   :  { %16 = vsyncpa [#allocation4], 0  ;;  %s4781_s27 = smov [#allocation5]   ;;  %s4663_s9 = scalar_lea.hbm %s5127_s3, 128 }
   0x4   :  { %s38_s28 = sshll.u32 %s4781_s27, 4  ;;  %p4664_p0 = scmp.ne.s32.totalorder %s5127_s3, %s4663_s9  ;;  %s39_s28 = int_to_ptr.vmem [resolvable:$true] %s38_s28 }
   0x5   :  { %p4667_p1 = scmp.lt.u32.totalorder %s4663_s9, %s5127_s3 }
   0x7   :  { %p4669_p2 = pnand %p4667_p1, %p4664_p0 }
   0x9   :  { %4672 = shalt.err (!%p4669_p2)
}
   0xa   :  { %s4673_s14 = scalar_lea.vmem %s39_s28, 128  ;;  %p4678_p4 = scmp.lt.s32.totalorder %s39_s28, %s39_s28 }
   0xb   :  { %p4674_p3 = scmp.ne.s32.totalorder %s39_s28, %s4673_s14  ;;  %p4679_p5 = scmp.lt.s32.totalorder %s4673_s14, %s4673_s14 }
   0xd   :  { %p4680_p6 = por %p4679_p5, %p4678_p4 }
   0xf   :  { %p4681_p7 = pnand %p4680_p6, %p4674_p3 }
  0x11   :  { %4684 = shalt.err (!%p4681_p7)
}
  0x12   :  { %s4782_s15 = smov 64   ;;  %s4783_s16 = smov 4  }
  0x13   :  { %44 = dma.hbm_to_vmem [thread:$0]  %s5127_s3, 128, %s39_s28, [#allocation6], %s4782_s15, %s4782_s15, %s4783_s16  }
  0x14   :  { %s4784_s19 = smov [#allocation2]   ;;  %s4685_s23 = scalar_lea.hbm %s5125_s1, 3072 }
  0x15   :  { %s24_s20 = sshll.u32 %s4784_s19, 4  ;;  %p4686_p8 = scmp.ne.s32.totalorder %s5125_s1, %s4685_s23  ;;  %s25_s20 = int_to_ptr.vmem [resolvable:$true] %s24_s20 }
  0x16   :  { %p4689_p9 = scmp.lt.u32.totalorder %s4685_s23, %s5125_s1 }
  0x18   :  { %p4691_p10 = pnand %p4689_p9, %p4686_p8 }
  0x1a   :  { %4694 = shalt.err (!%p4691_p10)
}
  0x1b   :  { %s4695_s29 = scalar_lea.vmem %s25_s20, 3072  ;;  %p4700_p12 = scmp.lt.s32.totalorder %s25_s20, %s25_s20 }
  0x1c   :  { %p4696_p11 = scmp.ne.s32.totalorder %s25_s20, %s4695_s29  ;;  %p4701_p13 = scmp.lt.s32.totalorder %s4695_s29, %s4695_s29 }
  0x1e   :  { %p4702_p0 = por %p4701_p13, %p4700_p12 }
  0x20   :  { %p4703_p1 = pnand %p4702_p0, %p4696_p11 }
  0x22   :  { %4706 = shalt.err (!%p4703_p1)
}
  0x23   :  { %s4785_s3 = smov 1024   ;;  %s4786_s9 = smov [#allocation7]  }
  0x24   :  { %30 = dma.hbm_to_vmem [thread:$0]  %s5125_s1, 3072, %s25_s20, [#allocation3], %s4785_s3, %s4785_s3, %s4782_s15  }
  0x25   :  { %s52_s10 = sshll.u32 %s4786_s9, 4  ;;  %s4787_s11 = smov [#allocation8]   ;;  %s53_s10 = int_to_ptr.vmem [resolvable:$true] %s52_s10 }
  0x26   :  { %s64_s12 = sshll.u32 %s4787_s11, 4  ;;  %s4707_s17 = scalar_lea.hbm %s5129_s5, 16384  ;;  %s65_s12 = int_to_ptr.vmem [resolvable:$true] %s64_s12 }
  0x27   :  { %p4708_p2 = scmp.ne.s32.totalorder %s5129_s5, %s4707_s17  ;;  %p4711_p3 = scmp.lt.u32.totalorder %s4707_s17, %s5129_s5 }
  0x29   :  { %p4713_p4 = pnand %p4711_p3, %p4708_p2 }
  0x2b   :  { %4716 = shalt.err (!%p4713_p4)
}
  0x2c   :  { %s4717_s1 = scalar_lea.vmem %s53_s10, 16384  ;;  %p4722_p6 = scmp.lt.s32.totalorder %s53_s10, %s53_s10 }
  0x2d   :  { %p4718_p5 = scmp.ne.s32.totalorder %s53_s10, %s4717_s1  ;;  %p4723_p7 = scmp.lt.s32.totalorder %s4717_s1, %s4717_s1 }
  0x2f   :  { %p4724_p8 = por %p4723_p7, %p4722_p6 }
  0x31   :  { %p4725_p9 = pnand %p4724_p8, %p4718_p5 }
  0x33   :  { %4728 = shalt.err (!%p4725_p9)
}
  0x34   :  { %58 = dma.hbm_to_vmem [thread:$0]  %s5129_s5, 16384, %s53_s10, [#allocation6], %s4782_s15, %s4782_s15, %s4783_s16  }
  0x35   :  { %s4729_s26 = scalar_lea.hbm %s5130_s6, 12288 }
  0x36   :  { %p4730_p10 = scmp.ne.s32.totalorder %s5130_s6, %s4729_s26  ;;  %p4733_p11 = scmp.lt.u32.totalorder %s4729_s26, %s5130_s6 }
  0x38   :  { %p4735_p12 = pnand %p4733_p11, %p4730_p10 }
  0x3a   :  { %4738 = shalt.err (!%p4735_p12)
}
  0x3b   :  { %s4739_s30 = scalar_lea.vmem %s65_s12, 12288  ;;  %p4744_p0 = scmp.lt.s32.totalorder %s65_s12, %s65_s12 }
  0x3c   :  { %p4740_p13 = scmp.ne.s32.totalorder %s65_s12, %s4739_s30  ;;  %p4745_p1 = scmp.lt.s32.totalorder %s4739_s30, %s4739_s30 }
  0x3e   :  { %p4746_p2 = por %p4745_p1, %p4744_p0 }
  0x40   :  { %p4747_p3 = pnand %p4746_p2, %p4740_p13 }
  0x42   :  { %4750 = shalt.err (!%p4747_p3)
}
  0x43   :  { %70 = dma.hbm_to_vmem [thread:$0]  %s5130_s6, 12288, %s65_s12, [#allocation9], %s4782_s15, %s4782_s15, %s4783_s16  }
  0x44   :  { %4773 = dma.done.wait [#allocation3], 3072  }
  0x45   :  { %4774 = vsyncadd [#allocation3], 4294964224 }
  0x46   :  { %4775 = dma.done.wait [#allocation6], 16512  }
  0x47   :  { %4776 = vsyncadd [#allocation6], 4294950784 }
  0x48   :  { %4777 = dma.done.wait [#allocation9], 12288  }
  0x49   :  { %4778 = vsyncadd [#allocation9], 4294955008  ;;  %v4414_v0 = vld [vmem:[#allocation7 + $0x40] sm:$0xff]   ;;  %v4418_v4 = vld [vmem:[#allocation7 + $0x48] sm:$0xff]   ;;  %vm1963_vm0 = vcmask 130048   ;;  %vm4789_vm1 = vmmov 0  }
  0x4a   :  { %v4415_v1 = vld [vmem:[#allocation7 + $0xc0] sm:$0xff]   ;;  %3739 = vmatprep.subr.bf16.mxu0 %v4414_v0  ;;  %v4419_v5 = vld [vmem:[#allocation7 + $0xc8] sm:$0xff]   ;;  %v4422_v8 = vld [vmem:[#allocation7 + $0x50] sm:$0xff]   ;;  %vm2032_vm2 = vcmask 1043456   ;;  %vm2028_vm3 = vcmask 195584   ;;  %vm3425_vm4 = vcmask 1041408  }
  0x4b   :  { %v4416_v2 = vld [vmem:[#allocation7] sm:$0xff]   ;;  %3767 = vmatprep.subr.bf16.mxu1 %v4415_v1  ;;  %v4420_v6 = vld [vmem:[#allocation7 + $0x8] sm:$0xff]   ;;  %v4423_v9 = vld [vmem:[#allocation7 + $0xd0] sm:$0xff]   ;;  %s4790_s12 = smov [#allocation10]  }
  0x4c   :  { %v4417_v3 = vld [vmem:[#allocation7 + $0x80] sm:$0xff]   ;;  %3740 = vmatpush3.bf16.msra.mxu0 %v4416_v2  ;;  %v4421_v7 = vld [vmem:[#allocation7 + $0x88] sm:$0xff]   ;;  %v4424_v10 = vld [vmem:[#allocation7 + $0x10] sm:$0xff]  }
  0x4d   :  { %3768 = vmatpush3.bf16.msra.mxu1 %v4417_v3  ;;  %3741 = vmatprep.subr.bf16.mxu0 %v4418_v4  ;;  %v4425_v11 = vld [vmem:[#allocation7 + $0x90] sm:$0xff]   ;;  %v4426_v12 = vld [vmem:[#allocation7 + $0x58] sm:$0xff]   ;;  %v4430_v16 = vld [vmem:[#allocation7 + $0x60] sm:$0xff]  }
  0x4e   :  { %3769 = vmatprep.subr.bf16.mxu1 %v4419_v5  ;;  %v4427_v13 = vld [vmem:[#allocation7 + $0xd8] sm:$0xff]   ;;  %v4431_v17 = vld [vmem:[#allocation7 + $0xe0] sm:$0xff]   ;;  %v4434_v20 = vld [vmem:[#allocation7 + $0x68] sm:$0xff]  }
  0x4f   :  { %v4428_v14 = vld [vmem:[#allocation7 + $0x18] sm:$0xff]   ;;  %v4432_v18 = vld [vmem:[#allocation7 + $0x20] sm:$0xff]   ;;  %v4435_v21 = vld [vmem:[#allocation7 + $0xe8] sm:$0xff]  }
  0x50   :  { %3742 = vmatpush3.bf16.msra.mxu0 %v4420_v6  ;;  %v4429_v15 = vld [vmem:[#allocation7 + $0x98] sm:$0xff]   ;;  %v4433_v19 = vld [vmem:[#allocation7 + $0xa0] sm:$0xff]   ;;  %v4436_v22 = vld [vmem:[#allocation7 + $0x28] sm:$0xff]  }
  0x51   :  { %3770 = vmatpush3.bf16.msra.mxu1 %v4421_v7  ;;  %3743 = vmatprep.subr.bf16.mxu0 %v4422_v8  ;;  %v4437_v23 = vld [vmem:[#allocation7 + $0xa8] sm:$0xff]   ;;  %v4438_v24 = vld [vmem:[#allocation7 + $0x70] sm:$0xff]   ;;  %v4442_v28 = vld [vmem:[#allocation7 + $0x78] sm:$0xff]  }
  0x52   :  { %3771 = vmatprep.subr.bf16.mxu1 %v4423_v9  ;;  %v4439_v25 = vld [vmem:[#allocation7 + $0xf0] sm:$0xff]   ;;  %v4443_v29 = vld [vmem:[#allocation7 + $0xf8] sm:$0xff]   ;;  %v87_v34 = vld [vmem:[#allocation2 + $0x8] sm:$0xff] }
  0x53   :  { %v4440_v26 = vld [vmem:[#allocation7 + $0x30] sm:$0xff]   ;;  %v4444_v30 = vld [vmem:[#allocation7 + $0x38] sm:$0xff]   ;;  %v95_v37 = vld [vmem:[#allocation2 + $0x48] sm:$0xff] }
  0x54   :  { %3744 = vmatpush3.bf16.msra.mxu0 %v4424_v10  ;;  %v4441_v27 = vld [vmem:[#allocation7 + $0xb0] sm:$0xff]   ;;  %v4445_v31 = vld [vmem:[#allocation7 + $0xb8] sm:$0xff]   ;;  %v3459_v38 = vcombine.low %v87_v34, %v95_v37  ;;  %v3460_v39 = vcombine.high %v87_v34, %v95_v37  ;;  %v4446_v40 = vld [vmem:[#allocation7 + $0x140] sm:$0xff]  }
  0x55   :  { %3772 = vmatpush3.bf16.msra.mxu1 %v4425_v11  ;;  %3745 = vmatprep.subr.bf16.mxu0 %v4426_v12  ;;  %v86_v32 = vld [vmem:[#allocation2] sm:$0xff]  ;;  %v4447_v41 = vld [vmem:[#allocation7 + $0x1c0] sm:$0xff]   ;;  %v4450_v44 = vld [vmem:[#allocation7 + $0x148] sm:$0xff]  }
  0x56   :  { %3773 = vmatprep.subr.bf16.mxu1 %v4427_v13  ;;  %v94_v33 = vld [vmem:[#allocation2 + $0x40] sm:$0xff]  ;;  %1355 = vmatprep.mubr.bf16.mxu1 %v3460_v39  ;;  %v4448_v42 = vld [vmem:[#allocation7 + $0x100] sm:$0xff]   ;;  %v4451_v45 = vld [vmem:[#allocation7 + $0x1c8] sm:$0xff]  }
  0x57   :  { %v3457_v35 = vcombine.low %v86_v32, %v94_v33  ;;  %v3458_v36 = vcombine.high %v86_v32, %v94_v33  ;;  %v4449_v43 = vld [vmem:[#allocation7 + $0x180] sm:$0xff]   ;;  %v4452_v46 = vld [vmem:[#allocation7 + $0x108] sm:$0xff]   ;;  %v4454_v48 = vld [vmem:[#allocation7 + $0x150] sm:$0xff]  }
  0x58   :  { %3746 = vmatpush3.bf16.msra.mxu0 %v4428_v14  ;;  %v4453_v47 = vld [vmem:[#allocation7 + $0x188] sm:$0xff]   ;;  %v4455_v49 = vld [vmem:[#allocation7 + $0x1d0] sm:$0xff]   ;;  %v4458_v52 = vld [vmem:[#allocation7 + $0x158] sm:$0xff]  }
  0x59   :  { %3774 = vmatpush3.bf16.msra.mxu1 %v4429_v15  ;;  %3747 = vmatprep.subr.bf16.mxu0 %v4430_v16  ;;  %v4456_v50 = vld [vmem:[#allocation7 + $0x110] sm:$0xff]   ;;  %v4459_v53 = vld [vmem:[#allocation7 + $0x1d8] sm:$0xff]   ;;  %v4462_v56 = vld [vmem:[#allocation7 + $0x160] sm:$0xff]  }
  0x5a   :  { %3775 = vmatprep.subr.bf16.mxu1 %v4431_v17  ;;  %1307 = vmatprep.mubr.bf16.mxu0 %v3458_v36  ;;  %v4457_v51 = vld [vmem:[#allocation7 + $0x190] sm:$0xff]   ;;  %v4460_v54 = vld [vmem:[#allocation7 + $0x118] sm:$0xff]   ;;  %v4463_v57 = vld [vmem:[#allocation7 + $0x1e0] sm:$0xff]  }
  0x5b   :  { %v4461_v55 = vld [vmem:[#allocation7 + $0x198] sm:$0xff]   ;;  %v4464_v58 = vld [vmem:[#allocation7 + $0x120] sm:$0xff]   ;;  %v4466_v60 = vld [vmem:[#allocation7 + $0x168] sm:$0xff]  }
  0x5c   :  { %3748 = vmatpush3.bf16.msra.mxu0 %v4432_v18  ;;  %v4465_v59 = vld [vmem:[#allocation7 + $0x1a0] sm:$0xff]   ;;  %v4467_v61 = vld [vmem:[#allocation7 + $0x1e8] sm:$0xff]   ;;  %v102_v62 = vld [vmem:[#allocation2 + $0x80] sm:$0xff] }
  0x5d   :  { %3776 = vmatpush3.bf16.msra.mxu1 %v4433_v19  ;;  %3749 = vmatprep.subr.bf16.mxu0 %v4434_v20  ;;  %v3474_v63 = vcombine.high %v102_v62, %v102_v62  ;;  %v4469_v0 = vld [vmem:[#allocation7 + $0x128] sm:$0xff]   ;;  %v3473_v1 = vcombine.low %v102_v62, %v102_v62  ;;  %v103_v3 = vld [vmem:[#allocation2 + $0x88] sm:$0xff]  ;;  %v4474_v6 = vld [vmem:[#allocation7 + $0x170] sm:$0xff]  }
  0x5e   :  { %3777 = vmatprep.subr.bf16.mxu1 %v4435_v21  ;;  %v4470_v2 = vld [vmem:[#allocation7 + $0x1a8] sm:$0xff]   ;;  %v3476_v4 = vcombine.high %v103_v3, %v103_v3  ;;  %v3475_v5 = vcombine.low %v103_v3, %v103_v3  ;;  %v4475_v7 = vld [vmem:[#allocation7 + $0x1f0] sm:$0xff]   ;;  %v4478_v10 = vld [vmem:[#allocation7 + $0x178] sm:$0xff]  }
  0x5f   :  { %v4476_v8 = vld [vmem:[#allocation7 + $0x130] sm:$0xff]   ;;  %v4479_v11 = vld [vmem:[#allocation7 + $0x1f8] sm:$0xff]   ;;  %v88_v14 = vld [vmem:[#allocation2 + $0x10] sm:$0xff] }
  0x60   :  { %3750 = vmatpush3.bf16.msra.mxu0 %v4436_v22  ;;  %v4477_v9 = vld [vmem:[#allocation7 + $0x1b0] sm:$0xff]   ;;  %v4480_v12 = vld [vmem:[#allocation7 + $0x138] sm:$0xff]   ;;  %v96_v15 = vld [vmem:[#allocation2 + $0x50] sm:$0xff] }
  0x61   :  { %3778 = vmatpush3.bf16.msra.mxu1 %v4437_v23  ;;  %3751 = vmatprep.subr.bf16.mxu0 %v4438_v24  ;;  %v4481_v13 = vld [vmem:[#allocation7 + $0x1b8] sm:$0xff]   ;;  %v89_v16 = vld [vmem:[#allocation2 + $0x18] sm:$0xff]  ;;  %v3461_v17 = vcombine.low %v88_v14, %v96_v15  ;;  %v3462_v18 = vcombine.high %v88_v14, %v96_v15  ;;  %v4482_v22 = vld [vmem:[#allocation7 + $0x240] sm:$0xff]  }
  0x62   :  { %3779 = vmatprep.subr.bf16.mxu1 %v4439_v25  ;;  %v97_v19 = vld [vmem:[#allocation2 + $0x58] sm:$0xff]  ;;  %v4483_v23 = vld [vmem:[#allocation7 + $0x2c0] sm:$0xff]  }
  0x63   :  { %v3463_v20 = vcombine.low %v89_v16, %v97_v19  ;;  %v3464_v21 = vcombine.high %v89_v16, %v97_v19  ;;  %v4484_v24 = vld [vmem:[#allocation7 + $0x200] sm:$0xff]   ;;  %v4492_v33 = vld [vmem:[#allocation7 + $0x250] sm:$0xff]  }
  0x64   :  { %3752 = vmatpush3.bf16.msra.mxu0 %v4440_v26  ;;  %v4485_v25 = vld [vmem:[#allocation7 + $0x280] sm:$0xff]   ;;  %v4486_v26 = vld [vmem:[#allocation7 + $0x248] sm:$0xff]   ;;  %v4493_v34 = vld [vmem:[#allocation7 + $0x2d0] sm:$0xff]  }
  0x65   :  { %3780 = vmatpush3.bf16.msra.mxu1 %v4441_v27  ;;  %3753 = vmatprep.subr.bf16.mxu0 %v4442_v28  ;;  %v4487_v27 = vld [vmem:[#allocation7 + $0x2c8] sm:$0xff]   ;;  %v4495_v37 = vld [vmem:[#allocation7 + $0x210] sm:$0xff]   ;;  %v91_v62 = vld [vmem:[#allocation2 + $0x28] sm:$0xff] }
  0x66   :  { %3781 = vmatprep.subr.bf16.mxu1 %v4443_v29  ;;  %v4488_v28 = vld [vmem:[#allocation7 + $0x208] sm:$0xff]   ;;  %v4496_v39 = vld [vmem:[#allocation7 + $0x290] sm:$0xff]  }
  0x67   :  { %v4489_v29 = vld [vmem:[#allocation7 + $0x288] sm:$0xff]   ;;  %v4528_v15 = vld [vmem:[#allocation7 + $0x350] sm:$0xff]  }
  0x68   :  { %3754 = vmatpush3.bf16.msra.mxu0 %v4444_v30  ;;  %v104_v30 = vld [vmem:[#allocation2 + $0x90] sm:$0xff]  ;;  %v4529_v16 = vld [vmem:[#allocation7 + $0x3d0] sm:$0xff]  }
  0x69   :  { %3782 = vmatpush3.bf16.msra.mxu1 %v4445_v31  ;;  %3795 = vmatprep.subr.bf16.mxu0 %v4446_v40  ;;  %v3478_v31 = vcombine.high %v104_v30, %v104_v30  ;;  %v3477_v32 = vcombine.low %v104_v30, %v104_v30  ;;  %v4498_v40 = vld [vmem:[#allocation7 + $0x258] sm:$0xff]   ;;  %v4531_v19 = vld [vmem:[#allocation7 + $0x310] sm:$0xff]   ;;  %v4542_v30 = vld [vmem:[#allocation7 + $0x368] sm:$0xff]  }
  0x6a   :  { %3823 = vmatprep.subr.bf16.mxu1 %v4447_v41  ;;  %v4499_v41 = vld [vmem:[#allocation7 + $0x2d8] sm:$0xff]  }
  0x6b   :  { %1308 = vmatmul.mubr.bf16.vlgmr.msra.gmra.mrb[0].mxu0 %v3457_v35  ;;  %v105_v35 = vld [vmem:[#allocation2 + $0x98] sm:$0xff] }
  0x6c   :  { %1356 = vmatmul.mubr.bf16.vlgmr.msra.gmra.mrb[0].mxu1 %v3459_v38  ;;  %3796 = vmatpush3.bf16.msra.mxu0 %v4448_v42  ;;  %v3480_v36 = vcombine.high %v105_v35, %v105_v35  ;;  %v3479_v38 = vcombine.low %v105_v35, %v105_v35  ;;  %v4500_v42 = vld [vmem:[#allocation7 + $0x218] sm:$0xff]   ;;  %v4547_v35 = vld [vmem:[#allocation7 + $0x3f0] sm:$0xff]  }
  0x6d   :  { %3824 = vmatpush3.bf16.msra.mxu1 %v4449_v43  ;;  %3797 = vmatprep.subr.bf16.mxu0 %v4450_v44  ;;  %v4501_v43 = vld [vmem:[#allocation7 + $0x298] sm:$0xff]   ;;  %v4502_v44 = vld [vmem:[#allocation7 + $0x260] sm:$0xff]  }
  0x6e   :  { %3825 = vmatprep.subr.bf16.mxu1 %v4451_v45  ;;  %1315 = vmatprep.mubr.bf16.mxu0 %v3474_v63  ;;  %v4503_v45 = vld [vmem:[#allocation7 + $0x2e0] sm:$0xff]  }
  0x6f   :  { %1363 = vmatprep.mubr.bf16.mxu1 %v3476_v4  ;;  %v4518_v4 = vld [vmem:[#allocation7 + $0x340] sm:$0xff]  }
  0x70   :  { %3798 = vmatpush3.bf16.msra.mxu0 %v4452_v46  ;;  %v4504_v46 = vld [vmem:[#allocation7 + $0x220] sm:$0xff]  }
  0x71   :  { %3826 = vmatpush3.bf16.msra.mxu1 %v4453_v47  ;;  %3799 = vmatprep.subr.bf16.mxu0 %v4454_v48  ;;  %v4505_v47 = vld [vmem:[#allocation7 + $0x2a0] sm:$0xff]   ;;  %v4506_v48 = vld [vmem:[#allocation7 + $0x268] sm:$0xff]  }
  0x72   :  { %3827 = vmatprep.subr.bf16.mxu1 %v4455_v49  ;;  %v4507_v49 = vld [vmem:[#allocation7 + $0x2e8] sm:$0xff]  }
  0x73   :  { %1316 = vmatmul.mubr.bf16.gmra.mrb[4].mxu0 %v3473_v1  ;;  %v99_v1 = vld [vmem:[#allocation2 + $0x68] sm:$0xff] }
  0x74   :  { %3800 = vmatpush3.bf16.msra.mxu0 %v4456_v50  ;;  %1364 = vmatmul.mubr.bf16.gmra.mrb[4].mxu1 %v3475_v5  ;;  %v4508_v50 = vld [vmem:[#allocation7 + $0x228] sm:$0xff]   ;;  %v3468_v3 = vcombine.high %v91_v62, %v99_v1  ;;  %v4519_v5 = vld [vmem:[#allocation7 + $0x3c0] sm:$0xff]  }
  0x75   :  { %3828 = vmatpush3.bf16.msra.mxu1 %v4457_v51  ;;  %3801 = vmatprep.subr.bf16.mxu0 %v4458_v52  ;;  %v4509_v51 = vld [vmem:[#allocation7 + $0x2a8] sm:$0xff]   ;;  %v4510_v52 = vld [vmem:[#allocation7 + $0x270] sm:$0xff]  }
  0x76   :  { %3829 = vmatprep.subr.bf16.mxu1 %v4459_v53  ;;  %1403 = vmatprep.mubr.bf16.mxu0 %v3462_v18  ;;  %v4511_v53 = vld [vmem:[#allocation7 + $0x2f0] sm:$0xff]  }
  0x77   :  { %1451 = vmatprep.mubr.bf16.mxu1 %v3464_v21  ;;  %v4532_v21 = vld [vmem:[#allocation7 + $0x390] sm:$0xff]  }
  0x78   :  { %3802 = vmatpush3.bf16.msra.mxu0 %v4460_v54  ;;  %v4512_v54 = vld [vmem:[#allocation7 + $0x230] sm:$0xff]  }
  0x79   :  { %3830 = vmatpush3.bf16.msra.mxu1 %v4461_v55  ;;  %3803 = vmatprep.subr.bf16.mxu0 %v4462_v56  ;;  %v4513_v55 = vld [vmem:[#allocation7 + $0x2b0] sm:$0xff]   ;;  %v4514_v56 = vld [vmem:[#allocation7 + $0x278] sm:$0xff]  }
  0x7a   :  { %3831 = vmatprep.subr.bf16.mxu1 %v4463_v57  ;;  %v4515_v57 = vld [vmem:[#allocation7 + $0x2f8] sm:$0xff]  }
  0x7c   :  { %3804 = vmatpush3.bf16.msra.mxu0 %v4464_v58  ;;  %v4516_v58 = vld [vmem:[#allocation7 + $0x238] sm:$0xff]  }
  0x7d   :  { %3832 = vmatpush3.bf16.msra.mxu1 %v4465_v59  ;;  %3805 = vmatprep.subr.bf16.mxu0 %v4466_v60  ;;  %v4517_v59 = vld [vmem:[#allocation7 + $0x2b8] sm:$0xff]  }
  0x7e   :  { %3833 = vmatprep.subr.bf16.mxu1 %v4467_v61  ;;  %v90_v60 = vld [vmem:[#allocation2 + $0x20] sm:$0xff] }
  0x7f   :  { %v98_v61 = vld [vmem:[#allocation2 + $0x60] sm:$0xff] }
  0x80   :  { %3806 = vmatpush3.bf16.msra.mxu0 %v4469_v0  ;;  %v3465_v63 = vcombine.low %v90_v60, %v98_v61  ;;  %v3466_v0 = vcombine.high %v90_v60, %v98_v61  ;;  %v4562_v60 = vld [vmem:[#allocation8 + $0x20] sm:$0xff]   ;;  %v4563_v61 = vld [vmem:[#allocation8 + $0x28] sm:$0xff]  }
  0x81   :  { %3834 = vmatpush3.bf16.msra.mxu1 %v4470_v2  ;;  %3807 = vmatprep.subr.bf16.mxu0 %v4474_v6  ;;  %v3467_v2 = vcombine.low %v91_v62, %v99_v1  ;;  %v4520_v6 = vld [vmem:[#allocation7 + $0x300] sm:$0xff]   ;;  %v4564_v62 = vld [vmem:[#allocation8 + $0x30] sm:$0xff]   ;;  %v4567_v1 = vld [vmem:[#allocation8 + $0x48] sm:$0xff]  }
  0x82   :  { %3835 = vmatprep.subr.bf16.mxu1 %v4475_v7  ;;  %v4521_v7 = vld [vmem:[#allocation7 + $0x380] sm:$0xff]  }
  0x84   :  { %3808 = vmatpush3.bf16.msra.mxu0 %v4476_v8  ;;  %v4522_v8 = vld [vmem:[#allocation7 + $0x348] sm:$0xff]  }
  0x85   :  { %3836 = vmatpush3.bf16.msra.mxu1 %v4477_v9  ;;  %3809 = vmatprep.subr.bf16.mxu0 %v4478_v10  ;;  %v4523_v9 = vld [vmem:[#allocation7 + $0x3c8] sm:$0xff]  }
  0x86   :  { %3837 = vmatprep.subr.bf16.mxu1 %v4479_v11  ;;  %v4524_v10 = vld [vmem:[#allocation7 + $0x308] sm:$0xff]  }
  0x87   :  { %v4525_v11 = vld [vmem:[#allocation7 + $0x388] sm:$0xff]  }
  0x88   :  { %3810 = vmatpush3.bf16.msra.mxu0 %v4480_v12  ;;  %v106_v12 = vld [vmem:[#allocation2 + $0xa0] sm:$0xff] }
  0x89   :  { %3838 = vmatpush3.bf16.msra.mxu1 %v4481_v13  ;;  %3851 = vmatprep.subr.bf16.mxu0 %v4482_v22  ;;  %v3482_v13 = vcombine.high %v106_v12, %v106_v12  ;;  %v3481_v14 = vcombine.low %v106_v12, %v106_v12  ;;  %v4534_v22 = vld [vmem:[#allocation7 + $0x358] sm:$0xff]  }
  0x8a   :  { %3879 = vmatprep.subr.bf16.mxu1 %v4483_v23  ;;  %v4535_v23 = vld [vmem:[#allocation7 + $0x3d8] sm:$0xff]  }
  0x8b   :  { %1404 = vmatmul.mubr.bf16.vlgmr.msra.gmra.mrb[8].mxu0 %v3461_v17  ;;  %v107_v17 = vld [vmem:[#allocation2 + $0xa8] sm:$0xff] }
  0x8c   :  { %1452 = vmatmul.mubr.bf16.vlgmr.msra.gmra.mrb[8].mxu1 %v3463_v20  ;;  %3852 = vmatpush3.bf16.msra.mxu0 %v4484_v24  ;;  %v3484_v18 = vcombine.high %v107_v17, %v107_v17  ;;  %v3483_v20 = vcombine.low %v107_v17, %v107_v17  ;;  %v4536_v24 = vld [vmem:[#allocation7 + $0x318] sm:$0xff]  }
  0x8d   :  { %3880 = vmatpush3.bf16.msra.mxu1 %v4485_v25  ;;  %3853 = vmatprep.subr.bf16.mxu0 %v4486_v26  ;;  %v4537_v25 = vld [vmem:[#allocation7 + $0x398] sm:$0xff]   ;;  %v4538_v26 = vld [vmem:[#allocation7 + $0x360] sm:$0xff]  }
  0x8e   :  { %3881 = vmatprep.subr.bf16.mxu1 %v4487_v27  ;;  %1411 = vmatprep.mubr.bf16.mxu0 %v3478_v31  ;;  %v4539_v27 = vld [vmem:[#allocation7 + $0x3e0] sm:$0xff]   ;;  %v4543_v31 = vld [vmem:[#allocation7 + $0x3e8] sm:$0xff]  }
  0x8f   :  { %1459 = vmatprep.mubr.bf16.mxu1 %v3480_v36  ;;  %v4548_v36 = vld [vmem:[#allocation7 + $0x330] sm:$0xff]  }
  0x90   :  { %3854 = vmatpush3.bf16.msra.mxu0 %v4488_v28  ;;  %v4540_v28 = vld [vmem:[#allocation7 + $0x320] sm:$0xff]  }
  0x91   :  { %3882 = vmatpush3.bf16.msra.mxu1 %v4489_v29  ;;  %3855 = vmatprep.subr.bf16.mxu0 %v4492_v33  ;;  %v4541_v29 = vld [vmem:[#allocation7 + $0x3a0] sm:$0xff]   ;;  %v4545_v33 = vld [vmem:[#allocation7 + $0x3a8] sm:$0xff]  }
  0x92   :  { %3883 = vmatprep.subr.bf16.mxu1 %v4493_v34  ;;  %v4546_v34 = vld [vmem:[#allocation7 + $0x370] sm:$0xff]  }
  0x93   :  { %1412 = vmatmul.mubr.bf16.gmra.mrb[12].mxu0 %v3477_v32  ;;  %v4544_v32 = vld [vmem:[#allocation7 + $0x328] sm:$0xff]  }
  0x94   :  { %3856 = vmatpush3.bf16.msra.mxu0 %v4495_v37  ;;  %1460 = vmatmul.mubr.bf16.gmra.mrb[12].mxu1 %v3479_v38  ;;  %v4549_v37 = vld [vmem:[#allocation7 + $0x3b0] sm:$0xff]   ;;  %v4550_v38 = vld [vmem:[#allocation7 + $0x378] sm:$0xff]  }
  0x95   :  { %3884 = vmatpush3.bf16.msra.mxu1 %v4496_v39  ;;  %3857 = vmatprep.subr.bf16.mxu0 %v4498_v40  ;;  %v4551_v39 = vld [vmem:[#allocation7 + $0x3f8] sm:$0xff]  }
  0x96   :  { %3885 = vmatprep.subr.bf16.mxu1 %v4499_v41  ;;  %1499 = vmatprep.mubr.bf16.mxu0 %v3466_v0  ;;  %v4552_v40 = vld [vmem:[#allocation7 + $0x338] sm:$0xff]   ;;  %v4566_v0 = vld [vmem:[#allocation8 + $0x40] sm:$0xff]  }
  0x97   :  { %1547 = vmatprep.mubr.bf16.mxu1 %v3468_v3  ;;  %v4553_v41 = vld [vmem:[#allocation7 + $0x3b8] sm:$0xff]  }
  0x98   :  { %3858 = vmatpush3.bf16.msra.mxu0 %v4500_v42  ;;  %v92_v42 = vld [vmem:[#allocation2 + $0x30] sm:$0xff] }
  0x99   :  { %3886 = vmatpush3.bf16.msra.mxu1 %v4501_v43  ;;  %3859 = vmatprep.subr.bf16.mxu0 %v4502_v44  ;;  %v100_v43 = vld [vmem:[#allocation2 + $0x70] sm:$0xff]  ;;  %v93_v44 = vld [vmem:[#allocation2 + $0x38] sm:$0xff] }
  0x9a   :  { %3887 = vmatprep.subr.bf16.mxu1 %v4503_v45  ;;  %v3469_v45 = vcombine.low %v92_v42, %v100_v43 }
  0x9c   :  { %3860 = vmatpush3.bf16.msra.mxu0 %v4504_v46  ;;  %v3470_v46 = vcombine.high %v92_v42, %v100_v43 }
  0x9d   :  { %3888 = vmatpush3.bf16.msra.mxu1 %v4505_v47  ;;  %3861 = vmatprep.subr.bf16.mxu0 %v4506_v48  ;;  %v101_v47 = vld [vmem:[#allocation2 + $0x78] sm:$0xff]  ;;  %v108_v48 = vld [vmem:[#allocation2 + $0xb0] sm:$0xff] }
  0x9e   :  { %3889 = vmatprep.subr.bf16.mxu1 %v4507_v49  ;;  %v109_v49 = vld [vmem:[#allocation2 + $0xb8] sm:$0xff] }
  0xa0   :  { %3862 = vmatpush3.bf16.msra.mxu0 %v4508_v50  ;;  %v3471_v50 = vcombine.low %v93_v44, %v101_v47 }
  0xa1   :  { %3890 = vmatpush3.bf16.msra.mxu1 %v4509_v51  ;;  %3863 = vmatprep.subr.bf16.mxu0 %v4510_v52  ;;  %v3472_v51 = vcombine.high %v93_v44, %v101_v47  ;;  %v3486_v52 = vcombine.high %v108_v48, %v108_v48 }
  0xa2   :  { %3891 = vmatprep.subr.bf16.mxu1 %v4511_v53  ;;  %v3488_v53 = vcombine.high %v109_v49, %v109_v49 }
  0xa4   :  { %3864 = vmatpush3.bf16.msra.mxu0 %v4512_v54  ;;  %v3485_v54 = vcombine.low %v108_v48, %v108_v48 }
  0xa5   :  { %3892 = vmatpush3.bf16.msra.mxu1 %v4513_v55  ;;  %3865 = vmatprep.subr.bf16.mxu0 %v4514_v56  ;;  %v3487_v55 = vcombine.low %v109_v49, %v109_v49  ;;  %v4558_v56 = vld [vmem:[#allocation8] sm:$0xff]  }
  0xa6   :  { %3893 = vmatprep.subr.bf16.mxu1 %v4515_v57  ;;  %v4559_v57 = vld [vmem:[#allocation8 + $0x8] sm:$0xff]  }
  0xa8   :  { %3866 = vmatpush3.bf16.msra.mxu0 %v4516_v58  ;;  %v4560_v58 = vld [vmem:[#allocation8 + $0x10] sm:$0xff]  }
  0xa9   :  { %3894 = vmatpush3.bf16.msra.mxu1 %v4517_v59  ;;  %3907 = vmatprep.subr.bf16.mxu0 %v4518_v4  ;;  %v4561_v59 = vld [vmem:[#allocation8 + $0x18] sm:$0xff]  }
  0xaa   :  { %3935 = vmatprep.subr.bf16.mxu1 %v4519_v5  ;;  %v3456_v5 = vld [vmem:[%s5131_s7] ss:$0 sm:$0xff] }
  0xab   :  { %1500 = vmatmul.mubr.bf16.vlgmr.msra.gmra.mrb[16].mxu0 %v3465_v63  ;;  %v4565_v63 = vld [vmem:[#allocation8 + $0x38] sm:$0xff]  }
  0xac   :  { %1548 = vmatmul.mubr.bf16.vlgmr.msra.gmra.mrb[16].mxu1 %v3467_v2  ;;  %3908 = vmatpush3.bf16.msra.mxu0 %v4520_v6  ;;  %v4568_v2 = vld [vmem:[#allocation8 + $0x50] sm:$0xff]  }
  0xad   :  { %3936 = vmatpush3.bf16.msra.mxu1 %v4521_v7  ;;  %3909 = vmatprep.subr.bf16.mxu0 %v4522_v8 }
  0xae   :  { %3937 = vmatprep.subr.bf16.mxu1 %v4523_v9  ;;  %1507 = vmatprep.mubr.bf16.mxu0 %v3482_v13 }
  0xaf   :  { %1555 = vmatprep.mubr.bf16.mxu1 %v3484_v18 }
  0xb0   :  { %3910 = vmatpush3.bf16.msra.mxu0 %v4524_v10  ;;  %v4569_v10 = vld [vmem:[#allocation8 + $0x58] sm:$0xff]  }
  0xb1   :  { %3938 = vmatpush3.bf16.msra.mxu1 %v4525_v11  ;;  %3911 = vmatprep.subr.bf16.mxu0 %v4528_v15 }
  0xb2   :  { %3939 = vmatprep.subr.bf16.mxu1 %v4529_v16 }
  0xb3   :  { %1508 = vmatmul.mubr.bf16.gmra.mrb[20].mxu0 %v3481_v14 }
  0xb4   :  { %3912 = vmatpush3.bf16.msra.mxu0 %v4531_v19  ;;  %1556 = vmatmul.mubr.bf16.gmra.mrb[20].mxu1 %v3483_v20  ;;  %v4570_v20 = vld [vmem:[#allocation8 + $0x60] sm:$0xff]  }
  0xb5   :  { %3940 = vmatpush3.bf16.msra.mxu1 %v4532_v21  ;;  %3913 = vmatprep.subr.bf16.mxu0 %v4534_v22  ;;  %v4571_v22 = vld [vmem:[#allocation8 + $0x68] sm:$0xff]  }
  0xb6   :  { %3941 = vmatprep.subr.bf16.mxu1 %v4535_v23  ;;  %1595 = vmatprep.mubr.bf16.mxu0 %v3470_v46 }
  0xb7   :  { %1643 = vmatprep.mubr.bf16.mxu1 %v3472_v51 }
  0xb8   :  { %3914 = vmatpush3.bf16.msra.mxu0 %v4536_v24 }
  0xb9   :  { %3942 = vmatpush3.bf16.msra.mxu1 %v4537_v25  ;;  %3915 = vmatprep.subr.bf16.mxu0 %v4538_v26 }
  0xba   :  { %3943 = vmatprep.subr.bf16.mxu1 %v4539_v27 }
  0xbc   :  { %3916 = vmatpush3.bf16.msra.mxu0 %v4540_v28 }
  0xbd   :  { %3944 = vmatpush3.bf16.msra.mxu1 %v4541_v29  ;;  %3917 = vmatprep.subr.bf16.mxu0 %v4542_v30 }
  0xbe   :  { %3945 = vmatprep.subr.bf16.mxu1 %v4543_v31 }
  0xc0   :  { %3918 = vmatpush3.bf16.msra.mxu0 %v4544_v32 }
  0xc1   :  { %3946 = vmatpush3.bf16.msra.mxu1 %v4545_v33  ;;  %3919 = vmatprep.subr.bf16.mxu0 %v4546_v34 }
  0xc2   :  { %3947 = vmatprep.subr.bf16.mxu1 %v4547_v35 }
  0xc4   :  { %3920 = vmatpush3.bf16.msra.mxu0 %v4548_v36 }
  0xc5   :  { %3948 = vmatpush3.bf16.msra.mxu1 %v4549_v37  ;;  %3921 = vmatprep.subr.bf16.mxu0 %v4550_v38 }
  0xc6   :  { %3949 = vmatprep.subr.bf16.mxu1 %v4551_v39 }
  0xc8   :  { %3922 = vmatpush3.bf16.msra.mxu0 %v4552_v40 }
  0xc9   :  { %3950 = vmatpush3.bf16.msra.mxu1 %v4553_v41  ;;  %4095 = vmatprep.subr.bf16.mxu0 %v4558_v56 }
  0xca   :  { %4115 = vmatprep.subr.bf16.mxu1 %v4566_v0 }
  0xcb   :  { %1596 = vmatmul.mubr.bf16.vlgmr.msra.gmra.mrb[24].mxu0 %v3469_v45 }
  0xcc   :  { %1644 = vmatmul.mubr.bf16.vlgmr.msra.gmra.mrb[24].mxu1 %v3471_v50  ;;  %1603 = vmatprep.mubr.bf16.mxu0 %v3486_v52 }
  0xcd   :  { %1651 = vmatprep.mubr.bf16.mxu1 %v3488_v53  ;;  %4096 = vmatpush3.bf16.msra.mxu0 %v4558_v56 }
  0xce   :  { %4097 = vmatprep.subr.bf16.mxu0 %v4559_v57  ;;  %4116 = vmatpush3.bf16.msra.mxu1 %v4566_v0 }
  0xcf   :  { %4117 = vmatprep.subr.bf16.mxu1 %v4567_v1 }
  0xd1   :  { %4098 = vmatpush3.bf16.msra.mxu0 %v4559_v57 }
  0xd2   :  { %4099 = vmatprep.subr.bf16.mxu0 %v4560_v58  ;;  %4118 = vmatpush3.bf16.msra.mxu1 %v4567_v1 }
  0xd3   :  { %1604 = vmatmul.mubr.bf16.gmra.mrb[28].mxu0 %v3485_v54  ;;  %4119 = vmatprep.subr.bf16.mxu1 %v4568_v2 }
  0xd4   :  { %1652 = vmatmul.mubr.bf16.gmra.mrb[28].mxu1 %v3487_v55 }
  0xd5   :  { %4100 = vmatpush3.bf16.msra.mxu0 %v4560_v58 }
  0xd6   :  { %4101 = vmatprep.subr.bf16.mxu0 %v4561_v59  ;;  %4120 = vmatpush3.bf16.msra.mxu1 %v4568_v2 }
  0xd7   :  { %4121 = vmatprep.subr.bf16.mxu1 %v4569_v10 }
  0xd9   :  { %4102 = vmatpush3.bf16.msra.mxu0 %v4561_v59 }
  0xda   :  { %4103 = vmatprep.subr.bf16.mxu0 %v4562_v60  ;;  %4122 = vmatpush3.bf16.msra.mxu1 %v4569_v10 }
  0xdb   :  { %4123 = vmatprep.subr.bf16.mxu1 %v4570_v20 }
  0xdd   :  { %4104 = vmatpush3.bf16.msra.mxu0 %v4562_v60 }
  0xde   :  { %4105 = vmatprep.subr.bf16.mxu0 %v4563_v61  ;;  %4124 = vmatpush3.bf16.msra.mxu1 %v4570_v20 }
  0xdf   :  { %4125 = vmatprep.subr.bf16.mxu1 %v4571_v22 }
  0xe1   :  { %4106 = vmatpush3.bf16.msra.mxu0 %v4563_v61 }
  0xe2   :  { %4107 = vmatprep.subr.bf16.mxu0 %v4564_v62  ;;  %4126 = vmatpush3.bf16.msra.mxu1 %v4571_v22 }
  0xe5   :  { %4108 = vmatpush3.bf16.msra.mxu0 %v4564_v62 }
  0xe6   :  { %4109 = vmatprep.subr.bf16.mxu0 %v4565_v63 }
  0xe9   :  { %4110 = vmatpush3.bf16.msra.mxu0 %v4565_v63 }
 0x13e   :  { %v3755_v3 = vpop.f32.mrb[0].mxu0 }
 0x13f   :  { %v3783_v4 = vpop.f32.mrb[0].mxu1  ;;  %v3756_v6 = vpop.f32.mrb[1].mxu0 }
 0x140   :  { %v3757_v7 = vadd.f32 %v3756_v6, %v3755_v3  ;;  %v3784_v8 = vpop.f32.mrb[1].mxu1  ;;  %v3758_v9 = vpop.f32.mrb[2].mxu0 }
 0x141   :  { %v3785_v11 = vadd.f32 %v3784_v8, %v3783_v4  ;;  %v3786_v12 = vpop.f32.mrb[2].mxu1  ;;  %v3759_v13 = vpop.f32.mrb[3].mxu0 }
 0x142   :  { %v1310_v14 = vadd.f32 %v3757_v7, %v3456_v5  ;;  %v3760_v15 = vadd.f32 %v3759_v13, %v3758_v9  ;;  %v3787_v16 = vpop.f32.mrb[3].mxu1 }
 0x143   :  { %v3788_v17 = vadd.f32 %v3787_v16, %v3786_v12 }
 0x144   :  { %v1358_v18 = vadd.f32 %v3785_v11, %v1310_v14  ;;  %v1313_v19 = vadd.f32 %v3760_v15, %v3456_v5 }
 0x146   :  { %v1361_v21 = vadd.f32 %v3788_v17, %v1313_v19  ;;  %v3761_v23 = vpop.f32.mrb[4].mxu0 }
 0x147   :  { %v3762_v24 = vpop.f32.mrb[5].mxu0  ;;  %v3789_v27 = vpop.f32.mrb[4].mxu1 }
 0x148   :  { %v3763_v25 = vadd.f32 %v3762_v24, %v3761_v23  ;;  %v3764_v26 = vpop.f32.mrb[6].mxu0  ;;  %v3790_v29 = vpop.f32.mrb[5].mxu1 }
 0x149   :  { %v3765_v28 = vpop.f32.mrb[7].mxu0  ;;  %v3791_v31 = vadd.f32 %v3790_v29, %v3789_v27  ;;  %v3792_v32 = vpop.f32.mrb[6].mxu1 }
 0x14a   :  { %v1318_v30 = vadd.f32 %v3763_v25, %v3456_v5  ;;  %v3793_v33 = vpop.f32.mrb[7].mxu1 }
 0x14c   :  { %v1366_v34 = vadd.f32 %v3791_v31, %v1318_v30 }
 0x15e   :  { %v3811_v35 = vpop.f32.mrb[8].mxu0 }
 0x15f   :  { %v3839_v36 = vpop.f32.mrb[8].mxu1  ;;  %v3812_v37 = vpop.f32.mrb[9].mxu0 }
 0x160   :  { %v3813_v38 = vadd.f32 %v3812_v37, %v3811_v35  ;;  %v3840_v39 = vpop.f32.mrb[9].mxu1  ;;  %v3814_v40 = vpop.f32.mrb[10].mxu0 }
 0x161   :  { %v3841_v41 = vadd.f32 %v3840_v39, %v3839_v36  ;;  %v3842_v42 = vpop.f32.mrb[10].mxu1  ;;  %v3815_v43 = vpop.f32.mrb[11].mxu0 }
 0x162   :  { %v1406_v44 = vadd.f32 %v3813_v38, %v1358_v18  ;;  %v3816_v45 = vadd.f32 %v3815_v43, %v3814_v40  ;;  %v3843_v46 = vpop.f32.mrb[11].mxu1 }
 0x163   :  { %v3844_v47 = vadd.f32 %v3843_v46, %v3842_v42 }
 0x164   :  { %v1454_v48 = vadd.f32 %v3841_v41, %v1406_v44  ;;  %v1409_v49 = vadd.f32 %v3816_v45, %v1361_v21 }
 0x166   :  { %v1457_v50 = vadd.f32 %v3844_v47, %v1409_v49  ;;  %v3817_v51 = vpop.f32.mrb[12].mxu0 }
 0x167   :  { %v3818_v52 = vpop.f32.mrb[13].mxu0  ;;  %v3845_v55 = vpop.f32.mrb[12].mxu1 }
 0x168   :  { %v3819_v53 = vadd.f32 %v3818_v52, %v3817_v51  ;;  %v3820_v54 = vpop.f32.mrb[14].mxu0  ;;  %v3846_v58 = vpop.f32.mrb[13].mxu1 }
 0x169   :  { %v3821_v56 = vpop.f32.mrb[15].mxu0  ;;  %v3847_v59 = vadd.f32 %v3846_v58, %v3845_v55  ;;  %v3848_v60 = vpop.f32.mrb[14].mxu1 }
 0x16a   :  { %v1414_v57 = vadd.f32 %v3819_v53, %v1366_v34  ;;  %v3849_v61 = vpop.f32.mrb[15].mxu1  ;;  %v4572_v60 = vld [vmem:[#allocation8 + $0x70] sm:$0xff]  }
 0x16b   :  { %4127 = vmatprep.subr.bf16.mxu1 %v4572_v60  ;;  %v4573_v61 = vld [vmem:[#allocation8 + $0x78] sm:$0xff]  }
 0x16c   :  { %v1462_v62 = vadd.f32 %v3847_v59, %v1414_v57  ;;  %4128 = vmatpush3.bf16.msra.mxu1 %v4572_v60  ;;  %v4593_v60 = vld [vmem:[#allocation8 + $0x1b8] sm:$0xff]  }
 0x16d   :  { %4129 = vmatprep.subr.bf16.mxu1 %v4573_v61 }
 0x170   :  { %4130 = vmatpush3.bf16.msra.mxu1 %v4573_v61  ;;  %v4600_v61 = vld [vmem:[#allocation8 + $0xf0] sm:$0xff]  }
 0x17e   :  { %v3867_v63 = vpop.f32.mrb[16].mxu0 }
 0x17f   :  { %v3895_v0 = vpop.f32.mrb[16].mxu1  ;;  %v3868_v1 = vpop.f32.mrb[17].mxu0 }
 0x180   :  { %v3869_v2 = vadd.f32 %v3868_v1, %v3867_v63  ;;  %v3896_v3 = vpop.f32.mrb[17].mxu1  ;;  %v3870_v4 = vpop.f32.mrb[18].mxu0  ;;  %v3617_v63 = vld [vmem:[%s5131_s7 + $0x1] ss:$0 sm:$0xff] }
 0x181   :  { %v3897_v5 = vadd.f32 %v3896_v3, %v3895_v0  ;;  %v3898_v6 = vpop.f32.mrb[18].mxu1  ;;  %v3871_v7 = vpop.f32.mrb[19].mxu0 }
 0x182   :  { %v1502_v8 = vadd.f32 %v3869_v2, %v1454_v48  ;;  %v3872_v9 = vadd.f32 %v3871_v7, %v3870_v4  ;;  %v3899_v10 = vpop.f32.mrb[19].mxu1 }
 0x183   :  { %v3900_v11 = vadd.f32 %v3899_v10, %v3898_v6 }
 0x184   :  { %v1550_v12 = vadd.f32 %v3897_v5, %v1502_v8  ;;  %v1505_v13 = vadd.f32 %v3872_v9, %v1457_v50 }
 0x186   :  { %v1553_v14 = vadd.f32 %v3900_v11, %v1505_v13  ;;  %v3873_v15 = vpop.f32.mrb[20].mxu0  ;;  %v4911_v11 = vld [vmem:[%s5126_s2] sm:$0xff]   ;;  %v4923_v13 = vld [vmem:[%s5126_s2 + $0x8] ss:$0 sps:$4 sm:$0xff]  }
 0x187   :  { %v3874_v16 = vpop.f32.mrb[21].mxu0  ;;  %v3901_v19 = vpop.f32.mrb[20].mxu1 }
 0x188   :  { %v3875_v17 = vadd.f32 %v3874_v16, %v3873_v15  ;;  %v3876_v18 = vpop.f32.mrb[22].mxu0  ;;  %v3902_v22 = vpop.f32.mrb[21].mxu1  ;;  %v3626_v15 = vld [vmem:[%s5131_s7 + $0x2] ss:$0 sm:$0xff] }
 0x189   :  { %v3877_v20 = vpop.f32.mrb[23].mxu0  ;;  %v3903_v23 = vadd.f32 %v3902_v22, %v3901_v19  ;;  %v3904_v24 = vpop.f32.mrb[22].mxu1 }
 0x18a   :  { %v1510_v21 = vadd.f32 %v3875_v17, %v1462_v62  ;;  %v3905_v25 = vpop.f32.mrb[23].mxu1  ;;  %v4900_v62 = vld [vmem:[%s5124_s0] sm:$0xff]  }
 0x18b   :  { %4135 = vmatprep.subr.bf16.mxu1 %v4900_v62 }
 0x18c   :  { %v1558_v26 = vadd.f32 %v3903_v23, %v1510_v21 }
 0x19e   :  { %v3923_v27 = vpop.f32.mrb[24].mxu0 }
 0x19f   :  { %v3951_v28 = vpop.f32.mrb[24].mxu1  ;;  %v3924_v29 = vpop.f32.mrb[25].mxu0 }
 0x1a0   :  { %v3925_v30 = vadd.f32 %v3924_v29, %v3923_v27  ;;  %v3952_v31 = vpop.f32.mrb[25].mxu1  ;;  %v3926_v32 = vpop.f32.mrb[26].mxu0  ;;  %v4938_v29 = vld [vmem:[#allocation5] sm:$0xff]  }
 0x1a1   :  { %v3953_v33 = vadd.f32 %v3952_v31, %v3951_v28  ;;  %v3954_v34 = vpop.f32.mrb[26].mxu1  ;;  %v3927_v35 = vpop.f32.mrb[27].mxu0  ;;  %v4579_v31 = vld [vmem:[#allocation8 + $0x88] sm:$0xff]  }
 0x1a2   :  { %v1598_v36 = vadd.f32 %v3925_v30, %v1550_v12  ;;  %v3928_v37 = vadd.f32 %v3927_v35, %v3926_v32  ;;  %v3955_v38 = vpop.f32.mrb[27].mxu1  ;;  %v4578_v30 = vld [vmem:[#allocation8 + $0x80] sm:$0xff]   ;;  %v4580_v32 = vld [vmem:[#allocation8 + $0x90] sm:$0xff]   ;;  %v4583_v35 = vld [vmem:[#allocation8 + $0xa8] sm:$0xff]  }
 0x1a3   :  { %v3956_v39 = vadd.f32 %v3955_v38, %v3954_v34  ;;  %v4582_v34 = vld [vmem:[#allocation8 + $0xa0] sm:$0xff]  }
 0x1a4   :  { %v1646_v40 = vadd.f32 %v3953_v33, %v1598_v36  ;;  %v1601_v41 = vadd.f32 %v3928_v37, %v1553_v14  ;;  %v4788_v14 = vmov 0.0   ;;  %v4581_v33 = vld [vmem:[#allocation8 + $0x98] sm:$0xff]   ;;  %v4584_v36 = vld [vmem:[#allocation8 + $0xb0] sm:$0xff]   ;;  %v4586_v38 = vld [vmem:[#allocation8 + $0x180] sm:$0xff]  }
 0x1a5   :  { %4141 = vmatprep.subr.bf16.mxu0 %v4788_v14  ;;  %v4585_v37 = vld [vmem:[#allocation8 + $0xb8] sm:$0xff]  }
 0x1a6   :  { %v1649_v42 = vadd.f32 %v3956_v39, %v1601_v41  ;;  %v3929_v43 = vpop.f32.mrb[28].mxu0  ;;  %v1659_v46 = vmax.f32 %v1646_v40, 0.0  ;;  %v4594_v39 = vld [vmem:[#allocation8 + $0xc0] sm:$0xff]   ;;  %v4595_v40 = vld [vmem:[#allocation8 + $0xc8] sm:$0xff]   ;;  %v4596_v41 = vld [vmem:[#allocation8 + $0xd0] sm:$0xff]  }
 0x1a7   :  { %v3957_v44 = vpop.f32.mrb[28].mxu1  ;;  %v3930_v45 = vpop.f32.mrb[29].mxu0 }
 0x1a8   :  { %v1660_v47 = vmax.f32 %v1649_v42, 0.0  ;;  %v3931_v48 = vadd.f32 %v3930_v45, %v3929_v43  ;;  %v3958_v49 = vpop.f32.mrb[29].mxu1  ;;  %v3932_v50 = vpop.f32.mrb[30].mxu0  ;;  %v4597_v42 = vld [vmem:[#allocation8 + $0xd8] sm:$0xff]   ;;  %v4598_v43 = vld [vmem:[#allocation8 + $0xe0] sm:$0xff]   ;;  %v1793_v45 = vunpack.c.l.bf16 %v4900_v62 }
 0x1a9   :  { %v3959_v51 = vadd.f32 %v3958_v49, %v3957_v44  ;;  %v3960_v52 = vpop.f32.mrb[30].mxu1  ;;  %v3933_v53 = vpop.f32.mrb[31].mxu0  ;;  %v4599_v44 = vld [vmem:[#allocation8 + $0xe8] sm:$0xff]  }
 0x1aa   :  { %v1606_v54 = vadd.f32 %v3931_v48, %v1558_v26  ;;  %v3961_v55 = vpop.f32.mrb[31].mxu1  ;;  %v1662_v56 = vpack.c.bf16 %v1660_v47, %v1659_v46  ;;  %v1794_v46 = vunpack.c.h.bf16 %v4900_v62 }
 0x1ab   :  { %v4588_v55 = vld [vmem:[#allocation8 + $0x190] sm:$0xff]  }
 0x1ac   :  { %v1654_v57 = vadd.f32 %v3959_v51, %v1606_v54  ;;  %4111 = vmatprep.mubr.bf16.mxu0 %v1662_v56  ;;  %v4587_v54 = vld [vmem:[#allocation8 + $0x188] sm:$0xff]   ;;  %v4589_v56 = vld [vmem:[#allocation8 + $0x198] sm:$0xff]  }
 0x1ae   :  { %v1661_v58 = vmax.f32 %v1654_v57, 0.0  ;;  %v4590_v57 = vld [vmem:[#allocation8 + $0x1a0] sm:$0xff]  }
 0x1b0   :  { %v1663_v59 = vpack.c.bf16 %v1661_v58, %v1661_v58  ;;  %v4591_v58 = vld [vmem:[#allocation8 + $0x1a8] sm:$0xff]  }
 0x1b2   :  { %4112 = vmatmul.mubr.bf16.vlgmr.msra.gmra.mrb[32].mxu0 %v1663_v59  ;;  %v4592_v59 = vld [vmem:[#allocation8 + $0x1b0] sm:$0xff]  }
 0x1b3   :  { %4145 = vmatprep.mubr.msk.bf16.mxu0 %vm4789_vm1, %v4788_v14 }
 0x285   :  { %v4113_v0 = vpop.f32.mrb[32].mxu0 }
 0x286   :  { %v1776_v1 = vadd.f32 %v4113_v0, %v3617_v63  ;;  %v1767_v2 = vpop.f32.mrb[33].mxu0 }
 0x287   :  { %v1768_v3 = vadd.f32 %v3617_v63, %v1767_v2  ;;  %v4114_v4 = vpop.f32.mrb[34].mxu0 }
 0x288   :  { %v1770_v5 = vpop.f32.mrb[35].mxu0  ;;  %v1783_v7 = vmax.f32 %v1776_v1, 0.0 }
 0x289   :  { %v1771_v6 = vadd.f32 %v3617_v63, %v1770_v5  ;;  %v1781_v8 = vmax.f32 %v1768_v3, 0.0  ;;  %v3642_v63 = vld [vmem:[%s5131_s7 + $0x3] ss:$0 sm:$0xff] }
 0x28a   :  { %v4913_v12 = vpack.c.bf16 %v1783_v7, %v1783_v7 }
 0x28b   :  { %v1782_v9 = vmax.f32 %v1771_v6, 0.0 }
 0x28d   :  { %v4906_v10 = vpack.c.bf16 %v1782_v9, %v1781_v8  ;;  %v3651_v9 = vld [vmem:[%s5131_s7 + $0x4] ss:$0 sm:$0xff] }
 0x28f   :  { %4131 = vmatprep.mubr.bf16.mxu1 %v4906_v10 }
 0x290   :  { %4132 = vmatmul.mubr.bf16.vlgmr.msra.gmra.mrb[32].mxu1 %v4913_v12 }
 0x291   :  { %4136 = vmatpush3.bf16.msra.mxu1 %v4900_v62  ;;  %4137 = vmatprep.mubr.msk.bf16.mxu1 %vm1963_vm0, %v4911_v11  ;;  %v4601_v62 = vld [vmem:[#allocation8 + $0xf8] sm:$0xff]  }
 0x292   :  { %4169 = vmatprep.subr.bf16.mxu1 %v4788_v14 }
 0x29c   :  { %4138 = vmatmul.mubr.msk.bf16.vlgmr.msra.gmra.mrb[32].mxu1 %vm1963_vm0, %v4923_v13 }
 0x29d   :  { %4185 = vmatprep.mubr.msk.bf16.mxu1 %vm4789_vm1, %v4788_v14  ;;  %4170 = vmatpush3.bf16.msra.mxu1 %v4594_v39  ;;  %v4602_v39 = vld [vmem:[#allocation8 + $0x1c0] sm:$0xff]  }
 0x29e   :  { %4171 = vmatprep.subr.bf16.mxu1 %v4788_v14 }
 0x2a1   :  { %4172 = vmatpush3.bf16.msra.mxu1 %v4595_v40  ;;  %v4603_v40 = vld [vmem:[#allocation8 + $0x1c8] sm:$0xff]  }
 0x2a2   :  { %4173 = vmatprep.subr.bf16.mxu1 %v4788_v14 }
 0x2a5   :  { %4174 = vmatpush3.bf16.msra.mxu1 %v4596_v41  ;;  %v4604_v41 = vld [vmem:[#allocation8 + $0x1d0] sm:$0xff]  }
 0x2a6   :  { %4175 = vmatprep.subr.bf16.mxu1 %v4788_v14 }
 0x2a9   :  { %4176 = vmatpush3.bf16.msra.mxu1 %v4597_v42  ;;  %v4605_v42 = vld [vmem:[#allocation8 + $0x1d8] sm:$0xff]  }
 0x2aa   :  { %4177 = vmatprep.subr.bf16.mxu1 %v4788_v14 }
 0x2ad   :  { %4178 = vmatpush3.bf16.msra.mxu1 %v4598_v43  ;;  %v4606_v43 = vld [vmem:[#allocation8 + $0x1e0] sm:$0xff]  }
 0x2ae   :  { %4179 = vmatprep.subr.bf16.mxu1 %v4788_v14 }
 0x2b1   :  { %4180 = vmatpush3.bf16.msra.mxu1 %v4599_v44  ;;  %v4607_v44 = vld [vmem:[#allocation8 + $0x1e8] sm:$0xff]  }
 0x2b2   :  { %4181 = vmatprep.subr.bf16.mxu1 %v4788_v14 }
 0x2b5   :  { %4182 = vmatpush3.bf16.msra.mxu1 %v4600_v61  ;;  %v4611_v61 = vld [vmem:[#allocation8 + $0x248] sm:$0xff]  }
 0x2b6   :  { %4183 = vmatprep.subr.bf16.mxu1 %v4788_v14 }
 0x2b9   :  { %4184 = vmatpush3.bf16.msra.mxu1 %v4601_v62  ;;  %v4612_v62 = vld [vmem:[#allocation8 + $0x250] sm:$0xff]  }
 0x2ba   :  { %4215 = vmatprep.subr.bf16.mxu1 %v4788_v14 }
 0x36f   :  { %v4139_v16 = vpop.f32.mrb[32].mxu1 }
 0x370   :  { %v4383_v17 = vadd.f32 %v4139_v16, %v3626_v15  ;;  %v2004_v18 = vpop.f32.mrb[33].mxu1 }
 0x371   :  { %v4384_v19 = vadd.f32 %v3626_v15, %v2004_v18  ;;  %v4140_v20 = vpop.f32.mrb[34].mxu1 }
 0x372   :  { %v2007_v21 = vpop.f32.mrb[35].mxu1  ;;  %v2020_v23 = vmax.f32 %v4383_v17, 0.0 }
 0x373   :  { %v4385_v22 = vadd.f32 %v3626_v15, %v2007_v21  ;;  %v2018_v24 = vmax.f32 %v4384_v19, 0.0 }
 0x374   :  { %v2022_v27 = vpack.c.bf16 %v2020_v23, %v2020_v23 }
 0x375   :  { %v2019_v25 = vmax.f32 %v4385_v22, 0.0 }
 0x376   :  { %v2034_v28 = vsel %vm2032_vm2, %v2022_v27, 0 }
 0x377   :  { %v2021_v26 = vpack.c.bf16 %v2019_v25, %v2018_v24  ;;  %v3660_v24 = vld [vmem:[%s5131_s7 + $0x7] ss:$0 sm:$0xff] }
 0x379   :  { %4142 = vmatpush3.bf16.msra.mxu0 %v2021_v26 }
 0x37a   :  { %4143 = vmatprep.subr.bf16.mxu0 %v4788_v14 }
 0x37d   :  { %4144 = vmatpush3.bf16.msra.mxu0 %v2034_v28 }
 0x37e   :  { %4149 = vmatprep.subr.bf16.mxu0 %v4788_v14 }
 0x380   :  { %4146 = vmatmul.mubr.msk.bf16.vlgmr.msra.gmra.mrb[36].mxu0 %vm2028_vm3, %v4938_v29 }
 0x381   :  { %4150 = vmatpush3.bf16.msra.mxu0 %v4578_v30  ;;  %4165 = vmatprep.mubr.msk.bf16.mxu0 %vm4789_vm1, %v4788_v14 }
 0x382   :  { %4151 = vmatprep.subr.bf16.mxu0 %v4788_v14 }
 0x385   :  { %4152 = vmatpush3.bf16.msra.mxu0 %v4579_v31 }
 0x386   :  { %4153 = vmatprep.subr.bf16.mxu0 %v4788_v14 }
 0x389   :  { %4154 = vmatpush3.bf16.msra.mxu0 %v4580_v32 }
 0x38a   :  { %4155 = vmatprep.subr.bf16.mxu0 %v4788_v14 }
 0x38d   :  { %4156 = vmatpush3.bf16.msra.mxu0 %v4581_v33 }
 0x38e   :  { %4157 = vmatprep.subr.bf16.mxu0 %v4788_v14 }
 0x391   :  { %4158 = vmatpush3.bf16.msra.mxu0 %v4582_v34 }
 0x392   :  { %4159 = vmatprep.subr.bf16.mxu0 %v4788_v14 }
 0x395   :  { %4160 = vmatpush3.bf16.msra.mxu0 %v4583_v35 }
 0x396   :  { %4161 = vmatprep.subr.bf16.mxu0 %v4788_v14 }
 0x399   :  { %4162 = vmatpush3.bf16.msra.mxu0 %v4584_v36 }
 0x39a   :  { %4163 = vmatprep.subr.bf16.mxu0 %v4788_v14 }
 0x39d   :  { %4164 = vmatpush3.bf16.msra.mxu0 %v4585_v37 }
 0x39e   :  { %4189 = vmatprep.subr.bf16.mxu0 %v4586_v38 }
 0x453   :  { %v2070_v47 = vpop.f32.mrb[36].mxu0 }
 0x454   :  { %v4147_v48 = vpop.f32.mrb[37].mxu0  ;;  %v2071_v50 = vadd.f32 %v2070_v47, %v1793_v45  ;;  %v4608_v45 = vld [vmem:[#allocation8 + $0x1f0] sm:$0xff]   ;;  %v4610_v47 = vld [vmem:[#allocation8 + $0x240] sm:$0xff]  }
 0x455   :  { %v2073_v49 = vpop.f32.mrb[38].mxu0  ;;  %v4618_v48 = vld [vmem:[#allocation8 + $0x200] sm:$0xff]  }
 0x456   :  { %v2074_v51 = vadd.f32 %v2073_v49, %v1794_v46  ;;  %v4148_v52 = vpop.f32.mrb[39].mxu0  ;;  %v4609_v46 = vld [vmem:[#allocation8 + $0x1f8] sm:$0xff]   ;;  %v4619_v49 = vld [vmem:[#allocation8 + $0x208] sm:$0xff]  }
 0x457   :  { %v4622_v52 = vld [vmem:[#allocation8 + $0x220] sm:$0xff]  }
 0x458   :  { %v2077_v53 = vpack.c.bf16 %v2074_v51, %v2071_v50  ;;  %v4620_v50 = vld [vmem:[#allocation8 + $0x210] sm:$0xff]   ;;  %v4621_v51 = vld [vmem:[#allocation8 + $0x218] sm:$0xff]  }
 0x45a   :  { %4166 = vmatmul.mubr.bf16.vlgmr.msra.gmra.mrb[40].mxu0 %v2077_v53  ;;  %v4623_v53 = vld [vmem:[#allocation8 + $0x228] sm:$0xff]  }
 0x45b   :  { %4190 = vmatpush3.bf16.msra.mxu0 %v4586_v38  ;;  %4205 = vmatprep.mubr.bf16.mxu0 %v4906_v10 }
 0x45c   :  { %4191 = vmatprep.subr.bf16.mxu0 %v4587_v54 }
 0x45f   :  { %4192 = vmatpush3.bf16.msra.mxu0 %v4587_v54 }
 0x460   :  { %4193 = vmatprep.subr.bf16.mxu0 %v4588_v55 }
 0x463   :  { %4194 = vmatpush3.bf16.msra.mxu0 %v4588_v55 }
 0x464   :  { %4195 = vmatprep.subr.bf16.mxu0 %v4589_v56 }
 0x467   :  { %4196 = vmatpush3.bf16.msra.mxu0 %v4589_v56 }
 0x468   :  { %4197 = vmatprep.subr.bf16.mxu0 %v4590_v57 }
 0x46b   :  { %4198 = vmatpush3.bf16.msra.mxu0 %v4590_v57 }
 0x46c   :  { %4199 = vmatprep.subr.bf16.mxu0 %v4591_v58 }
 0x46f   :  { %4200 = vmatpush3.bf16.msra.mxu0 %v4591_v58 }
 0x470   :  { %4201 = vmatprep.subr.bf16.mxu0 %v4592_v59 }
 0x473   :  { %4202 = vmatpush3.bf16.msra.mxu0 %v4592_v59 }
 0x474   :  { %4203 = vmatprep.subr.bf16.mxu0 %v4593_v60 }
 0x477   :  { %4204 = vmatpush3.bf16.msra.mxu0 %v4593_v60 }
 0x47a   :  { %4206 = vmatmul.mubr.bf16.vlgmr.msra.gmra.mrb[44].mxu0 %v4913_v12 }
 0x47b   :  { %4211 = vmatprep.mubr.msk.bf16.mxu0 %vm1963_vm0, %v4911_v11 }
 0x52d   :  { %v2164_v0 = vpop.f32.mrb[40].mxu0 }
 0x52e   :  { %v2165_v1 = vadd.f32 %v3642_v63, %v2164_v0  ;;  %v4167_v2 = vpop.f32.mrb[41].mxu0  ;;  %v4614_v0 = vld [vmem:[#allocation8 + $0x260] sm:$0xff]  }
 0x52f   :  { %v2167_v3 = vpop.f32.mrb[42].mxu0  ;;  %v4616_v2 = vld [vmem:[#allocation8 + $0x270] sm:$0xff]  }
 0x530   :  { %v2168_v4 = vadd.f32 %v3642_v63, %v2167_v3  ;;  %v4168_v5 = vpop.f32.mrb[43].mxu0  ;;  %v2171_v6 = vmax.f32 %v2165_v1, 0.0  ;;  %v4613_v63 = vld [vmem:[#allocation8 + $0x258] sm:$0xff]   ;;  %v4615_v1 = vld [vmem:[#allocation8 + $0x268] sm:$0xff]  }
 0x531   :  { %v4617_v3 = vld [vmem:[#allocation8 + $0x278] sm:$0xff]   ;;  %v3672_v5 = vld [vmem:[%s5131_s7 + $0x8] ss:$0 sm:$0xff] }
 0x532   :  { %v2172_v7 = vmax.f32 %v2168_v4, 0.0  ;;  %v4625_v4 = vld [vmem:[#allocation8 + $0x238] sm:$0xff]  }
 0x534   :  { %v2173_v8 = vpack.c.bf16 %v2172_v7, %v2171_v6 }
 0x536   :  { %4186 = vmatmul.mubr.bf16.vlgmr.msra.gmra.mrb[36].mxu1 %v2173_v8 }
 0x537   :  { %4219 = vmatprep.mubr.msk.bf16.mxu1 %vm4789_vm1, %v4788_v14 }
 0x609   :  { %v2260_v15 = vpop.f32.mrb[36].mxu1 }
 0x60a   :  { %v4974_v16 = vadd.f32 %v3651_v9, %v2260_v15  ;;  %v4187_v17 = vpop.f32.mrb[37].mxu1 }
 0x60b   :  { %v2263_v18 = vpop.f32.mrb[38].mxu1 }
 0x60c   :  { %v4976_v19 = vadd.f32 %v3651_v9, %v2263_v18  ;;  %v4188_v20 = vpop.f32.mrb[39].mxu1  ;;  %v2267_v21 = vmax.f32 %v4974_v16, 0.0  ;;  %v3681_v18 = vld [vmem:[%s5131_s7 + $0x9] ss:$0 sm:$0xff] }
 0x60e   :  { %v2268_v22 = vmax.f32 %v4976_v19, 0.0 }
 0x610   :  { %v2423_v23 = vpack.c.bf16 %v2268_v22, %v2267_v21 }
 0x612   :  { %4209 = vmatprep.subr.bf16.mxu0 %v2423_v23 }
 0x613   :  { %4210 = vmatpush3.bf16.msra.mxu0 %v2423_v23 }
 0x614   :  { %4243 = vmatprep.subr.bf16.mxu0 %v4788_v14 }
 0x616   :  { %4212 = vmatmul.mubr.msk.bf16.vlgmr.msra.gmra.mrb[44].mxu0 %vm1963_vm0, %v4923_v13 }
 0x617   :  { %4259 = vmatprep.mubr.msk.bf16.mxu0 %vm4789_vm1, %v4788_v14  ;;  %4244 = vmatpush3.bf16.msra.mxu0 %v4618_v48  ;;  %v4633_v48 = vld [vmem:[#allocation8 + $0x2b8] sm:$0xff]  }
 0x618   :  { %4245 = vmatprep.subr.bf16.mxu0 %v4788_v14 }
 0x61b   :  { %4246 = vmatpush3.bf16.msra.mxu0 %v4619_v49  ;;  %v4634_v49 = vld [vmem:[#allocation8 + $0x2c0] sm:$0xff]  }
 0x61c   :  { %4247 = vmatprep.subr.bf16.mxu0 %v4788_v14 }
 0x61f   :  { %4248 = vmatpush3.bf16.msra.mxu0 %v4620_v50  ;;  %v4635_v50 = vld [vmem:[#allocation8 + $0x2c8] sm:$0xff]  }
 0x620   :  { %4249 = vmatprep.subr.bf16.mxu0 %v4788_v14 }
 0x623   :  { %4250 = vmatpush3.bf16.msra.mxu0 %v4621_v51  ;;  %v4636_v51 = vld [vmem:[#allocation8 + $0x2d0] sm:$0xff]  }
 0x624   :  { %4251 = vmatprep.subr.bf16.mxu0 %v4788_v14 }
 0x627   :  { %4252 = vmatpush3.bf16.msra.mxu0 %v4622_v52  ;;  %v4637_v52 = vld [vmem:[#allocation8 + $0x2d8] sm:$0xff]  }
 0x628   :  { %4253 = vmatprep.subr.bf16.mxu0 %v4788_v14 }
 0x62b   :  { %4254 = vmatpush3.bf16.msra.mxu0 %v4623_v53  ;;  %v4638_v53 = vld [vmem:[#allocation8 + $0x2e0] sm:$0xff]  }
 0x62c   :  { %4255 = vmatprep.subr.bf16.mxu0 %v4788_v14 }
 0x6e9   :  { %v4213_v25 = vpop.f32.mrb[44].mxu0 }
 0x6ea   :  { %v4386_v26 = vadd.f32 %v4213_v25, %v3660_v24  ;;  %v2458_v27 = vpop.f32.mrb[45].mxu0 }
 0x6eb   :  { %v4387_v28 = vadd.f32 %v3660_v24, %v2458_v27  ;;  %v4214_v30 = vpop.f32.mrb[46].mxu0 }
 0x6ec   :  { %v2461_v31 = vpop.f32.mrb[47].mxu0  ;;  %v2474_v33 = vmax.f32 %v4386_v26, 0.0 }
 0x6ed   :  { %v4388_v32 = vadd.f32 %v3660_v24, %v2461_v31  ;;  %v2472_v34 = vmax.f32 %v4387_v28, 0.0  ;;  %v3690_v28 = vld [vmem:[%s5131_s7 + $0xa] ss:$0 sm:$0xff] }
 0x6ee   :  { %v2476_v37 = vpack.c.bf16 %v2474_v33, %v2474_v33 }
 0x6ef   :  { %v2473_v35 = vmax.f32 %v4388_v32, 0.0 }
 0x6f0   :  { %v2478_v38 = vsel %vm2032_vm2, %v2476_v37, 0 }
 0x6f1   :  { %v2475_v36 = vpack.c.bf16 %v2473_v35, %v2472_v34 }
 0x6f3   :  { %4216 = vmatpush3.bf16.msra.mxu1 %v2475_v36 }
 0x6f4   :  { %4217 = vmatprep.subr.bf16.mxu1 %v4788_v14 }
 0x6f7   :  { %4218 = vmatpush3.bf16.msra.mxu1 %v2478_v38 }
 0x6f8   :  { %4223 = vmatprep.subr.bf16.mxu1 %v4788_v14 }
 0x6fa   :  { %4220 = vmatmul.mubr.msk.bf16.vlgmr.msra.gmra.mrb[40].mxu1 %vm2028_vm3, %v4938_v29 }
 0x6fb   :  { %4224 = vmatpush3.bf16.msra.mxu1 %v4602_v39  ;;  %4239 = vmatprep.mubr.msk.bf16.mxu1 %vm4789_vm1, %v4788_v14 }
 0x6fc   :  { %4225 = vmatprep.subr.bf16.mxu1 %v4788_v14 }
 0x6ff   :  { %4226 = vmatpush3.bf16.msra.mxu1 %v4603_v40 }
 0x700   :  { %4227 = vmatprep.subr.bf16.mxu1 %v4788_v14 }
 0x703   :  { %4228 = vmatpush3.bf16.msra.mxu1 %v4604_v41 }
 0x704   :  { %4229 = vmatprep.subr.bf16.mxu1 %v4788_v14 }
 0x707   :  { %4230 = vmatpush3.bf16.msra.mxu1 %v4605_v42  ;;  %v4626_v42 = vld [vmem:[#allocation8 + $0x280] sm:$0xff]  }
 0x708   :  { %4231 = vmatprep.subr.bf16.mxu1 %v4788_v14 }
 0x70b   :  { %4232 = vmatpush3.bf16.msra.mxu1 %v4606_v43  ;;  %v4627_v43 = vld [vmem:[#allocation8 + $0x288] sm:$0xff]  }
 0x70c   :  { %4233 = vmatprep.subr.bf16.mxu1 %v4788_v14 }
 0x70f   :  { %4234 = vmatpush3.bf16.msra.mxu1 %v4607_v44  ;;  %v4628_v44 = vld [vmem:[#allocation8 + $0x290] sm:$0xff]  }
 0x710   :  { %4235 = vmatprep.subr.bf16.mxu1 %v4788_v14 }
 0x713   :  { %4236 = vmatpush3.bf16.msra.mxu1 %v4608_v45  ;;  %v4629_v45 = vld [vmem:[#allocation8 + $0x298] sm:$0xff]  }
 0x714   :  { %4237 = vmatprep.subr.bf16.mxu1 %v4788_v14 }
 0x717   :  { %4238 = vmatpush3.bf16.msra.mxu1 %v4609_v46  ;;  %v4630_v46 = vld [vmem:[#allocation8 + $0x2a0] sm:$0xff]  }
 0x718   :  { %4263 = vmatprep.subr.bf16.mxu1 %v4610_v47 }
 0x7cd   :  { %v2514_v54 = vpop.f32.mrb[40].mxu1 }
 0x7ce   :  { %v4221_v55 = vpop.f32.mrb[41].mxu1  ;;  %v2515_v57 = vadd.f32 %v2514_v54, %v2267_v21  ;;  %v4639_v54 = vld [vmem:[#allocation8 + $0x2e8] sm:$0xff]  }
 0x7cf   :  { %v2517_v56 = vpop.f32.mrb[42].mxu1 }
 0x7d0   :  { %v2518_v58 = vadd.f32 %v2517_v56, %v2268_v22  ;;  %v4222_v59 = vpop.f32.mrb[43].mxu1 }
 0x7d2   :  { %v2521_v60 = vpack.c.bf16 %v2518_v58, %v2515_v57 }
 0x7d4   :  { %4240 = vmatmul.mubr.bf16.vlgmr.msra.gmra.mrb[44].mxu1 %v2521_v60 }
 0x7d5   :  { %4264 = vmatpush3.bf16.msra.mxu1 %v4610_v47  ;;  %4279 = vmatprep.mubr.bf16.mxu1 %v4906_v10  ;;  %v4624_v10 = vld [vmem:[#allocation8 + $0x230] sm:$0xff]  }
 0x7d6   :  { %4265 = vmatprep.subr.bf16.mxu1 %v4611_v61  ;;  %4256 = vmatpush3.bf16.msra.mxu0 %v4624_v10  ;;  %v4632_v47 = vld [vmem:[#allocation8 + $0x2b0] sm:$0xff]  }
 0x7d7   :  { %4257 = vmatprep.subr.bf16.mxu0 %v4788_v14 }
 0x7d9   :  { %4266 = vmatpush3.bf16.msra.mxu1 %v4611_v61 }
 0x7da   :  { %4267 = vmatprep.subr.bf16.mxu1 %v4612_v62  ;;  %4258 = vmatpush3.bf16.msra.mxu0 %v4625_v4 }
 0x7db   :  { %4289 = vmatprep.subr.bf16.mxu0 %v4788_v14 }
 0x7dd   :  { %4268 = vmatpush3.bf16.msra.mxu1 %v4612_v62  ;;  %v4640_v62 = vld [vmem:[#allocation8 + $0x2f0] sm:$0xff]  }
 0x7de   :  { %4269 = vmatprep.subr.bf16.mxu1 %v4613_v63 }
 0x7e1   :  { %4270 = vmatpush3.bf16.msra.mxu1 %v4613_v63  ;;  %v4641_v63 = vld [vmem:[#allocation8 + $0x2f8] sm:$0xff]  }
 0x7e2   :  { %4271 = vmatprep.subr.bf16.mxu1 %v4614_v0 }
 0x7e5   :  { %4272 = vmatpush3.bf16.msra.mxu1 %v4614_v0  ;;  %v3702_v0 = vld [vmem:[%s5131_s7 + $0xb] ss:$0 sm:$0xff] }
 0x7e6   :  { %4273 = vmatprep.subr.bf16.mxu1 %v4615_v1 }
 0x7e9   :  { %4274 = vmatpush3.bf16.msra.mxu1 %v4615_v1 }
 0x7ea   :  { %4275 = vmatprep.subr.bf16.mxu1 %v4616_v2 }
 0x7ed   :  { %4276 = vmatpush3.bf16.msra.mxu1 %v4616_v2 }
 0x7ee   :  { %4277 = vmatprep.subr.bf16.mxu1 %v4617_v3 }
 0x7f1   :  { %4278 = vmatpush3.bf16.msra.mxu1 %v4617_v3 }
 0x7f4   :  { %4280 = vmatmul.mubr.bf16.vlgmr.msra.gmra.mrb[48].mxu1 %v4913_v12 }
 0x7f5   :  { %4285 = vmatprep.mubr.msk.bf16.mxu1 %vm1963_vm0, %v4911_v11 }
 0x8a7   :  { %v2608_v6 = vpop.f32.mrb[44].mxu1 }
 0x8a8   :  { %v2609_v7 = vadd.f32 %v3672_v5, %v2608_v6  ;;  %v4241_v8 = vpop.f32.mrb[45].mxu1 }
 0x8a9   :  { %v2611_v9 = vpop.f32.mrb[46].mxu1 }
 0x8aa   :  { %v2612_v12 = vadd.f32 %v3672_v5, %v2611_v9  ;;  %v4242_v15 = vpop.f32.mrb[47].mxu1  ;;  %v2615_v16 = vmax.f32 %v2609_v7, 0.0  ;;  %v4642_v9 = vld [vmem:[#allocation8 + $0x100] sm:$0xff]  }
 0x8ab   :  { %v4644_v15 = vld [vmem:[#allocation8 + $0x110] sm:$0xff]  }
 0x8ac   :  { %v2616_v11 = vmax.f32 %v2612_v12, 0.0  ;;  %v4643_v12 = vld [vmem:[#allocation8 + $0x108] sm:$0xff]  }
 0x8ae   :  { %v2617_v17 = vpack.c.bf16 %v2616_v11, %v2615_v16  ;;  %v4645_v16 = vld [vmem:[#allocation8 + $0x118] sm:$0xff]   ;;  %v4646_v11 = vld [vmem:[#allocation8 + $0x120] sm:$0xff]  }
 0x8b0   :  { %4260 = vmatmul.mubr.bf16.vlgmr.msra.gmra.mrb[48].mxu0 %v2617_v17  ;;  %v4647_v17 = vld [vmem:[#allocation8 + $0x128] sm:$0xff]  }
 0x8b1   :  { %4293 = vmatprep.mubr.msk.bf16.mxu0 %vm4789_vm1, %v4788_v14 }
 0x983   :  { %v2704_v19 = vpop.f32.mrb[48].mxu0 }
 0x984   :  { %v5030_v20 = vadd.f32 %v3681_v18, %v2704_v19  ;;  %v4261_v21 = vpop.f32.mrb[49].mxu0  ;;  %v3711_v19 = vld [vmem:[%s5131_s7 + $0xc] ss:$0 sm:$0xff] }
 0x985   :  { %v2707_v22 = vpop.f32.mrb[50].mxu0 }
 0x986   :  { %v5032_v23 = vadd.f32 %v3681_v18, %v2707_v22  ;;  %v4262_v24 = vpop.f32.mrb[51].mxu0  ;;  %v2711_v25 = vmax.f32 %v5030_v20, 0.0  ;;  %v4648_v18 = vld [vmem:[#allocation8 + $0x130] sm:$0xff]  }
 0x988   :  { %v2712_v26 = vmax.f32 %v5032_v23, 0.0 }
 0x98a   :  { %v2867_v27 = vpack.c.bf16 %v2712_v26, %v2711_v25 }
 0x98c   :  { %4283 = vmatprep.subr.bf16.mxu1 %v2867_v27 }
 0x98d   :  { %4284 = vmatpush3.bf16.msra.mxu1 %v2867_v27 }
 0x98e   :  { %4317 = vmatprep.subr.bf16.mxu1 %v4788_v14 }
 0x990   :  { %4286 = vmatmul.mubr.msk.bf16.vlgmr.msra.gmra.mrb[48].mxu1 %vm1963_vm0, %v4923_v13 }
 0x991   :  { %4333 = vmatprep.mubr.msk.bf16.mxu1 %vm4789_vm1, %v4788_v14  ;;  %4318 = vmatpush3.bf16.msra.mxu1 %v4634_v49 }
 0x992   :  { %4319 = vmatprep.subr.bf16.mxu1 %v4788_v14 }
 0x995   :  { %4320 = vmatpush3.bf16.msra.mxu1 %v4635_v50 }
 0x996   :  { %4321 = vmatprep.subr.bf16.mxu1 %v4788_v14 }
 0x999   :  { %4322 = vmatpush3.bf16.msra.mxu1 %v4636_v51  ;;  %v3730_v51 = vld [vmem:[%s5131_s7 + $0x6] ss:$0 sm:$0xff] }
 0x99a   :  { %4323 = vmatprep.subr.bf16.mxu1 %v4788_v14 }
 0x99d   :  { %4324 = vmatpush3.bf16.msra.mxu1 %v4637_v52 }
 0x99e   :  { %4325 = vmatprep.subr.bf16.mxu1 %v4788_v14 }
 0x9a1   :  { %4326 = vmatpush3.bf16.msra.mxu1 %v4638_v53 }
 0x9a2   :  { %4327 = vmatprep.subr.bf16.mxu1 %v4788_v14 }
 0x9a5   :  { %4328 = vmatpush3.bf16.msra.mxu1 %v4639_v54 }
 0x9a6   :  { %4329 = vmatprep.subr.bf16.mxu1 %v4788_v14 }
 0x9a9   :  { %4330 = vmatpush3.bf16.msra.mxu1 %v4640_v62 }
 0x9aa   :  { %4331 = vmatprep.subr.bf16.mxu1 %v4788_v14 }
 0x9ad   :  { %4332 = vmatpush3.bf16.msra.mxu1 %v4641_v63 }
 0x9ae   :  { %4343 = vmatprep.subr.bf16.mxu1 %v4788_v14 }
 0xa63   :  { %v4287_v30 = vpop.f32.mrb[48].mxu1 }
 0xa64   :  { %v4389_v31 = vadd.f32 %v4287_v30, %v3690_v28  ;;  %v2902_v32 = vpop.f32.mrb[49].mxu1  ;;  %v3157_v30 = vld [vmem:[%s5128_s4] sm:$0x1] }
 0xa65   :  { %v4390_v33 = vadd.f32 %v3690_v28, %v2902_v32  ;;  %v4288_v34 = vpop.f32.mrb[50].mxu1  ;;  %v4650_v32 = vld [vmem:[#allocation8 + $0x140] sm:$0xff]  }
 0xa66   :  { %v2905_v35 = vpop.f32.mrb[51].mxu1  ;;  %v2918_v37 = vmax.f32 %v4389_v31, 0.0  ;;  %v4649_v31 = vld [vmem:[#allocation8 + $0x138] sm:$0xff]   ;;  %v4652_v34 = vld [vmem:[#allocation8 + $0x150] sm:$0xff]  }
 0xa67   :  { %v4391_v36 = vadd.f32 %v3690_v28, %v2905_v35  ;;  %v2916_v38 = vmax.f32 %v4390_v33, 0.0  ;;  %v4651_v33 = vld [vmem:[#allocation8 + $0x148] sm:$0xff]   ;;  %v4653_v35 = vld [vmem:[#allocation8 + $0x158] sm:$0xff]  }
 0xa68   :  { %v2920_v41 = vpack.c.bf16 %v2918_v37, %v2918_v37  ;;  %v4655_v37 = vld [vmem:[#allocation8 + $0x168] sm:$0xff]  }
 0xa69   :  { %v2917_v39 = vmax.f32 %v4391_v36, 0.0  ;;  %v4654_v36 = vld [vmem:[#allocation8 + $0x160] sm:$0xff]  }
 0xa6a   :  { %v2922_v13 = vsel %vm2032_vm2, %v2920_v41, 0 }
 0xa6b   :  { %v2919_v40 = vpack.c.bf16 %v2917_v39, %v2916_v38 }
 0xa6d   :  { %4290 = vmatpush3.bf16.msra.mxu0 %v2919_v40 }
 0xa6e   :  { %4291 = vmatprep.subr.bf16.mxu0 %v4788_v14 }
 0xa71   :  { %4292 = vmatpush3.bf16.msra.mxu0 %v2922_v13 }
 0xa72   :  { %4297 = vmatprep.subr.bf16.mxu0 %v4788_v14 }
 0xa74   :  { %4294 = vmatmul.mubr.msk.bf16.vlgmr.msra.gmra.mrb[52].mxu0 %vm2028_vm3, %v4938_v29  ;;  %v4631_v29 = vld [vmem:[#allocation8 + $0x2a8] sm:$0xff]  }
 0xa75   :  { %4298 = vmatpush3.bf16.msra.mxu0 %v4626_v42  ;;  %4313 = vmatprep.mubr.msk.bf16.mxu0 %vm4789_vm1, %v4788_v14  ;;  %v4656_v42 = vld [vmem:[#allocation8 + $0x170] sm:$0xff]  }
 0xa76   :  { %4299 = vmatprep.subr.bf16.mxu0 %v4788_v14 }
 0xa79   :  { %4300 = vmatpush3.bf16.msra.mxu0 %v4627_v43  ;;  %v4657_v43 = vld [vmem:[#allocation8 + $0x178] sm:$0xff]  }
 0xa7a   :  { %4301 = vmatprep.subr.bf16.mxu0 %v4788_v14 }
 0xa7d   :  { %4302 = vmatpush3.bf16.msra.mxu0 %v4628_v44  ;;  %v3721_v44 = vld [vmem:[%s5131_s7 + $0x5] ss:$0 sm:$0xff]  ;;  %s3445_s7 = sshll.u32 %s4790_s12, 4  ;;  %s3446_s7 = int_to_ptr.vmem [resolvable:$true] %s3445_s7 }
 0xa7e   :  { %4303 = vmatprep.subr.bf16.mxu0 %v4788_v14  ;;  %s4751_s0 = scalar_lea.vmem %s3446_s7, 32  ;;  %p4756_p5 = scmp.lt.s32.totalorder %s3446_s7, %s3446_s7 }
 0xa7f   :  { %p4752_p4 = scmp.ne.s32.totalorder %s3446_s7, %s4751_s0  ;;  %p4757_p6 = scmp.lt.s32.totalorder %s4751_s0, %s4751_s0 }
 0xa81   :  { %4304 = vmatpush3.bf16.msra.mxu0 %v4629_v45  ;;  %p4758_p7 = por %p4757_p6, %p4756_p5 }
 0xa82   :  { %4305 = vmatprep.subr.bf16.mxu0 %v4788_v14 }
 0xa83   :  { %p4759_p8 = pnand %p4758_p7, %p4752_p4 }
 0xa85   :  { %4306 = vmatpush3.bf16.msra.mxu0 %v4630_v46 }
 0xa86   :  { %4307 = vmatprep.subr.bf16.mxu0 %v4788_v14 }
 0xa89   :  { %4308 = vmatpush3.bf16.msra.mxu0 %v4631_v29 }
 0xa8a   :  { %4309 = vmatprep.subr.bf16.mxu0 %v4788_v14 }
 0xa8d   :  { %4310 = vmatpush3.bf16.msra.mxu0 %v4632_v47 }
 0xa8e   :  { %4311 = vmatprep.subr.bf16.mxu0 %v4788_v14 }
 0xa91   :  { %4312 = vmatpush3.bf16.msra.mxu0 %v4633_v48 }
 0xa92   :  { %4337 = vmatprep.subr.bf16.mxu0 %v4788_v14 }
 0xb47   :  { %v2958_v55 = vpop.f32.mrb[52].mxu0 }
 0xb48   :  { %v4295_v56 = vpop.f32.mrb[53].mxu0  ;;  %v2959_v58 = vadd.f32 %v2958_v55, %v2711_v25 }
 0xb49   :  { %v2961_v57 = vpop.f32.mrb[54].mxu0 }
 0xb4a   :  { %v2962_v59 = vadd.f32 %v2961_v57, %v2712_v26  ;;  %v4296_v60 = vpop.f32.mrb[55].mxu0 }
 0xb4c   :  { %v2965_v61 = vpack.c.bf16 %v2962_v59, %v2959_v58 }
 0xb4e   :  { %4314 = vmatmul.mubr.bf16.vlgmr.msra.gmra.mrb[56].mxu0 %v2965_v61 }
 0xb4f   :  { %4339 = vmatprep.mubr.msk.bf16.mxu0 %vm4789_vm1, %v4788_v14 }
 0xc21   :  { %v3052_v1 = vpop.f32.mrb[56].mxu0 }
 0xc22   :  { %v3053_v2 = vadd.f32 %v3702_v0, %v3052_v1  ;;  %v4315_v3 = vpop.f32.mrb[57].mxu0 }
 0xc23   :  { %v3055_v10 = vpop.f32.mrb[58].mxu0 }
 0xc24   :  { %v3056_v4 = vadd.f32 %v3702_v0, %v3055_v10  ;;  %v4316_v5 = vpop.f32.mrb[59].mxu0  ;;  %v3059_v6 = vmax.f32 %v3053_v2, 0.0 }
 0xc26   :  { %v3060_v7 = vmax.f32 %v3056_v4, 0.0 }
 0xc28   :  { %v3061_v8 = vpack.c.bf16 %v3060_v7, %v3059_v6 }
 0xc2a   :  { %4334 = vmatmul.mubr.bf16.vlgmr.msra.gmra.mrb[52].mxu1 %v3061_v8 }
 0xc2b   :  { %4359 = vmatprep.mubr.msk.bf16.mxu1 %vm4789_vm1, %v4788_v14  ;;  %4344 = vmatpush3.bf16.msra.mxu1 %v4642_v9 }
 0xc2c   :  { %4345 = vmatprep.subr.bf16.mxu1 %v4788_v14 }
 0xc2f   :  { %4346 = vmatpush3.bf16.msra.mxu1 %v4643_v12 }
 0xc30   :  { %4347 = vmatprep.subr.bf16.mxu1 %v4788_v14 }
 0xc33   :  { %4348 = vmatpush3.bf16.msra.mxu1 %v4644_v15 }
 0xc34   :  { %4349 = vmatprep.subr.bf16.mxu1 %v4788_v14 }
 0xc37   :  { %4350 = vmatpush3.bf16.msra.mxu1 %v4645_v16 }
 0xc38   :  { %4351 = vmatprep.subr.bf16.mxu1 %v4788_v14 }
 0xc3b   :  { %4352 = vmatpush3.bf16.msra.mxu1 %v4646_v11 }
 0xc3c   :  { %4353 = vmatprep.subr.bf16.mxu1 %v4788_v14 }
 0xc3f   :  { %4354 = vmatpush3.bf16.msra.mxu1 %v4647_v17 }
 0xc40   :  { %4355 = vmatprep.subr.bf16.mxu1 %v4788_v14 }
 0xc43   :  { %4356 = vmatpush3.bf16.msra.mxu1 %v4648_v18 }
 0xc44   :  { %4357 = vmatprep.subr.bf16.mxu1 %v4788_v14 }
 0xc47   :  { %4358 = vmatpush3.bf16.msra.mxu1 %v4649_v31 }
 0xcfd   :  { %v3148_v20 = vpop.f32.mrb[52].mxu1 }
 0xcfe   :  { %v3149_v21 = vadd.f32 %v3711_v19, %v3148_v20  ;;  %v4335_v22 = vpop.f32.mrb[53].mxu1 }
 0xcff   :  { %v3151_v23 = vpop.f32.mrb[54].mxu1 }
 0xd00   :  { %v3152_v24 = vadd.f32 %v3711_v19, %v3151_v23  ;;  %v4336_v25 = vpop.f32.mrb[55].mxu1  ;;  %v3155_v26 = vmax.f32 %v3149_v21, 0.0 }
 0xd02   :  { %v3156_v27 = vmax.f32 %v3152_v24, 0.0 }
 0xd04   :  { %v3158_v28 = vpack.c.bf16 %v3156_v27, %v3155_v26 }
 0xd06   :  { %4338 = vmatpush3.bf16.msra.mxu0 %v3158_v28 }
 0xd07   :  { %4363 = vmatprep.subr.bf16.mxu0 %v4788_v14 }
 0xd09   :  { %4340 = vmatmul.mubr.msk.bf16.vlgmr.msra.gmra.mrb[60].mxu0 %vm1963_vm0, %v3157_v30 }
 0xd0a   :  { %4379 = vmatprep.mubr.msk.bf16.mxu0 %vm4789_vm1, %v4788_v14  ;;  %4364 = vmatpush3.bf16.msra.mxu0 %v4650_v32 }
 0xd0b   :  { %4365 = vmatprep.subr.bf16.mxu0 %v4788_v14 }
 0xd0e   :  { %4366 = vmatpush3.bf16.msra.mxu0 %v4651_v33 }
 0xd0f   :  { %4367 = vmatprep.subr.bf16.mxu0 %v4788_v14 }
 0xd12   :  { %4368 = vmatpush3.bf16.msra.mxu0 %v4652_v34 }
 0xd13   :  { %4369 = vmatprep.subr.bf16.mxu0 %v4788_v14 }
 0xd16   :  { %4370 = vmatpush3.bf16.msra.mxu0 %v4653_v35 }
 0xd17   :  { %4371 = vmatprep.subr.bf16.mxu0 %v4788_v14 }
 0xd1a   :  { %4372 = vmatpush3.bf16.msra.mxu0 %v4654_v36 }
 0xd1b   :  { %4373 = vmatprep.subr.bf16.mxu0 %v4788_v14 }
 0xd1e   :  { %4374 = vmatpush3.bf16.msra.mxu0 %v4655_v37 }
 0xd1f   :  { %4375 = vmatprep.subr.bf16.mxu0 %v4788_v14 }
 0xd22   :  { %4376 = vmatpush3.bf16.msra.mxu0 %v4656_v42 }
 0xd23   :  { %4377 = vmatprep.subr.bf16.mxu0 %v4788_v14 }
 0xd26   :  { %4378 = vmatpush3.bf16.msra.mxu0 %v4657_v43 }
 0xddc   :  { %v3196_v38 = vpop.f32.mrb[60].mxu0 }
 0xddd   :  { %v3202_v39 = vpack.c.bf16 %v3196_v38, %v3196_v38  ;;  %v4341_v40 = vpop.f32.mrb[61].mxu0 }
 0xdde   :  { %v3199_v41 = vpop.f32.mrb[62].mxu0 }
 0xddf   :  { %4360 = vmatmul.mubr.bf16.vlgmr.msra.gmra.mrb[56].mxu1 %v3202_v39  ;;  %v4342_v13 = vpop.f32.mrb[63].mxu0 }
 0xeb2   :  { %v3307_v45 = vpop.f32.mrb[56].mxu1 }
 0xeb3   :  { %v3308_v46 = vadd.f32 %v3721_v44, %v3307_v45  ;;  %v4361_v29 = vpop.f32.mrb[57].mxu1 }
 0xeb4   :  { %v3310_v47 = vpop.f32.mrb[58].mxu1 }
 0xeb5   :  { %v3313_v48 = vmax.f32 %v3308_v46, 0.0  ;;  %v4362_v49 = vpop.f32.mrb[59].mxu1 }
 0xeb7   :  { %v3314_v50 = vpack.c.bf16 %v3313_v48, %v3313_v48 }
 0xeb9   :  { %4380 = vmatmul.mubr.bf16.vlgmr.msra.gmra.mrb[64].mxu0 %v3314_v50 }
 0xf8c   :  { %v3419_v52 = vpop.f32.mrb[64].mxu0 }
 0xf8d   :  { %v3420_v14 = vadd.f32 %v3730_v51, %v3419_v52  ;;  %v4381_v53 = vpop.f32.mrb[65].mxu0 }
 0xf8e   :  { %v3422_v54 = vpop.f32.mrb[66].mxu0 }
 0xf8f   :  { %v3426_v55 = vsel %vm3425_vm4, %v3420_v14, -inf  ;;  %v4382_v56 = vpop.f32.mrb[67].mxu0 }
 0xf90   :  { %3427 = vmax.xlane.f32.xlu0 %v3426_v55 }
0x101d   :  { %v3428_v57 = vpop.xlane.xlu0 %3427 }
0x101e   :  { %v3429_v58 = vsub.f32 %v3420_v14, %v3428_v57 }
0x1020   :  { %v3430_v59 = vmul.f32 1.442695, %v3429_v58 }
0x1022   :  { %4659 = vpow2.f32 %v3430_v59 }
0x102c   :  { %v4660_v60 = vpop.eup %4659 }
0x102d   :  { %v3432_v61 = vsel %vm3425_vm4, %v4660_v60, 0.0 }
0x102e   :  { %3433 = vadd.xlane.f32.xlu0 %v3432_v61 }
0x10bb   :  { %v3434_v62 = vpop.xlane.xlu0 %3433 }
0x10bc   :  { %4661 = vlog2.f32 %v3434_v62 }
0x10c6   :  { %v4662_v63 = vpop.eup %4661 }
0x10c7   :  { %v3436_v0 = vmul.f32 0.6931472, %v4662_v63 }
0x10c9   :  { %v3437_v1 = vsub.f32 %v3429_v58, %v3436_v0 }
0x10cb   :  { %3438 = vst [vmem:[#allocation10] sm:$0x3] %v3437_v1 }
0x10cc   :  { %4762 = shalt.err (!%p4759_p8)
}
0x10cd   :  { %s4763_s17 = scalar_lea.hbm %s5132_s8, 32 }
0x10ce   :  { %p4764_p9 = scmp.ne.s32.totalorder %s5132_s8, %s4763_s17  ;;  %p4767_p10 = scmp.lt.u32.totalorder %s4763_s17, %s5132_s8 }
0x10d0   :  { %p4769_p11 = pnand %p4767_p10, %p4764_p9 }
0x10d2   :  { %4772 = shalt.err (!%p4769_p11)
}
0x10d3   :  { %3448 = dma.vmem_to_hbm [thread:$0]  %s3446_s7, 32, %s5132_s8, [#allocation4]  }
0x10d4   :  { %4779 = dma.done.wait [#allocation4], 32  }
0x10d5   :  { %4780 = vsyncadd [#allocation4], 4294967264 }
0x10d6   :  { %3452 = vsyncpa [#allocation3], 1 }
0x10d7   :  { %3453 = vsyncpa [#allocation6], 1 }
0x10d8   :  { %3454 = vsyncpa [#allocation9], 1 }
0x10d9   :  { %3455 = vsyncpa [#allocation4], 1 }

</bundles_post_ra>
